<compile_context>
chip_gen: v7x
topology: tpu7x:2x2x1
jax: 0.10.0
libtpu: 0.0.40
codegen_flags: <defaults>
</compile_context>

<pallas_src>
import jax
import jax.numpy as jnp
from jax.experimental import pallas as pl
from jax.experimental.pallas import tpu as pltpu

IN_FEATURES = 32 * 32 * 3   # 3072
HIDDEN_DIM = 256
OUT_FEATURES = 10
OUT_PADDED = 128            # lane-dense output width (zero-padded, sliced outside)


def _round_up(a, m):
    return ((a + m - 1) // m) * m


def mlp_kernel(x_ref, w1_ref, b1_ref, w2_ref, b2_ref, o_ref):
    # Cast activations to bf16 on-chip; weights arrive pre-cast in bf16.
    x_bf = x_ref[...].astype(jnp.bfloat16)
    # First linear: bf16 on the MXU, f32 accumulation.
    h = jnp.dot(x_bf, w1_ref[...], preferred_element_type=jnp.float32)
    h = jnp.maximum(h + b1_ref[...], 0.0)          # bias + ReLU in f32 (VPU)
    # Dropout(p=0.3) is identity in eval/inference mode.
    # TODO(synk): training-mode dropout (PRNG mask + 1/(1-p) scale) not emitted.
    out = jnp.dot(h.astype(jnp.bfloat16), w2_ref[...],
                  preferred_element_type=jnp.float32)
    o_ref[...] = (out + b2_ref[...]).astype(o_ref.dtype)


def mlp_forward(x_nchw, w1, b1, w2, b2):
    B = x_nchw.shape[0]
    # nn.Flatten on NCHW: row-major flatten of (C, H, W) per sample.
    x2d = x_nchw.reshape(B, -1).astype(jnp.float32)
    assert x2d.shape[1] == IN_FEATURES

    # Weights pre-cast once to bf16 (halves the resident-weight DMA); biases f32.
    w1_bf = w1.astype(jnp.bfloat16)
    b1_2d = b1.reshape(1, -1).astype(jnp.float32)

    # Lane-dense second layer: pad N from 10 -> 128 with zero columns.
    w2_pad = jnp.zeros((HIDDEN_DIM, OUT_PADDED), jnp.bfloat16)
    w2_pad = w2_pad.at[:, :OUT_FEATURES].set(w2.astype(jnp.bfloat16))
    b2_pad = jnp.zeros((1, OUT_PADDED), jnp.float32)
    b2_pad = b2_pad.at[:, :OUT_FEATURES].set(b2.reshape(1, -1).astype(jnp.float32))

    # Batch tiling: big tiles amortize the ~0.35us per-step overhead while the
    # working set (~20 MiB at tile 512) stays well inside the VMEM limit.
    tile_b = min(512, _round_up(B, 8))
    b_pad = _round_up(B, tile_b)
    if b_pad != B:
        x2d = jnp.pad(x2d, ((0, b_pad - B), (0, 0)))
    grid = (b_pad // tile_b,)

    flops = 2 * b_pad * (IN_FEATURES * HIDDEN_DIM + HIDDEN_DIM * OUT_PADDED)
    bytes_accessed = (
        x2d.size * 4 + w1_bf.size * 2 + w2_pad.size * 2
        + b1_2d.size * 4 + b2_pad.size * 4 + b_pad * OUT_PADDED * 4
    )

    out = pl.pallas_call(
        mlp_kernel,
        out_shape=jax.ShapeDtypeStruct((b_pad, OUT_PADDED), jnp.float32),
        grid=grid,
        in_specs=[
            pl.BlockSpec((tile_b, IN_FEATURES), lambda i: (i, 0)),
            pl.BlockSpec((IN_FEATURES, HIDDEN_DIM), lambda i: (0, 0)),
            pl.BlockSpec((1, HIDDEN_DIM), lambda i: (0, 0)),
            pl.BlockSpec((HIDDEN_DIM, OUT_PADDED), lambda i: (0, 0)),
            pl.BlockSpec((1, OUT_PADDED), lambda i: (0, 0)),
        ],
        out_specs=pl.BlockSpec((tile_b, OUT_PADDED), lambda i: (i, 0)),
        compiler_params=pltpu.CompilerParams(
            dimension_semantics=("parallel",),   # shard batch tiles over TCs (v7x)
            vmem_limit_bytes=32 << 20,
        ),
        cost_estimate=pl.CostEstimate(
            flops=flops, transcendentals=0, bytes_accessed=bytes_accessed),
    )(x2d, w1_bf, b1_2d, w2_pad, b2_pad)

    # Strip batch padding and the zero lane-padding columns.
    return out[:B, :OUT_FEATURES]


def init_params(key, hidden_dim=HIDDEN_DIM):
    # Deterministic He-normal-like init for weights, zero biases
    # (mirrors _initialize_weights('he')).
    k1, k2 = jax.random.split(key)
    std1 = (2.0 / IN_FEATURES) ** 0.5
    std2 = (2.0 / hidden_dim) ** 0.5
    # Stored transposed relative to PyTorch (in_features, out_features) so the
    # kernel computes x @ W directly.
    w1 = jax.random.normal(k1, (IN_FEATURES, hidden_dim), jnp.float32) * std1
    b1 = jnp.zeros((hidden_dim,), jnp.float32)
    w2 = jax.random.normal(k2, (hidden_dim, OUT_FEATURES), jnp.float32) * std2
    b2 = jnp.zeros((OUT_FEATURES,), jnp.float32)
    return w1, b1, w2, b2


if __name__ == "__main__":
    key = jax.random.PRNGKey(0)
    kx, kp = jax.random.split(key)

    batch = 2
    x = jax.random.normal(kx, (batch, 3, 32, 32), jnp.float32)  # NCHW like PyTorch
    w1, b1, w2, b2 = init_params(kp)

    out = mlp_forward(x, w1, b1, w2, b2)
    out = jax.block_until_ready(out)

    # Pure-JAX reference with the same bf16-weight / f32-accumulation numerics.
    x2d = x.reshape(batch, -1).astype(jnp.bfloat16)
    h_ref = jnp.maximum(
        jnp.dot(x2d, w1.astype(jnp.bfloat16),
                preferred_element_type=jnp.float32) + b1, 0.0)
    ref = jnp.dot(h_ref.astype(jnp.bfloat16), w2.astype(jnp.bfloat16),
                  preferred_element_type=jnp.float32) + b2

    assert out.shape == (batch, 10)
    assert jnp.allclose(out, ref, atol=2e-2, rtol=2e-2)

    print("KERNEL_OK")
</pallas_src>

<mosaic_0001>
module attributes {stable_mosaic.version = 11 : i64} {
  func.func @mlp_kernel(%arg0: i32, %arg1: memref<8x3072xf32, #tpu.memory_space<vmem>>, %arg2: memref<3072x256xbf16, #tpu.memory_space<vmem>>, %arg3: memref<1x256xf32, #tpu.memory_space<vmem>>, %arg4: memref<256x128xbf16, #tpu.memory_space<vmem>>, %arg5: memref<1x128xf32, #tpu.memory_space<vmem>>, %arg6: memref<8x128xf32, #tpu.memory_space<vmem>>) attributes {dimension_semantics = [#tpu.dimension_semantics<parallel>], iteration_bounds = array<i64: 1>, scalar_prefetch = 0 : i64, scratch_operands = 0 : i64, tpu.core_type = #tpu.core_type<tc>, window_params = [{transform_indices = @transform_0, window_bounds = array<i64: 8, 3072>}, {pipeline_mode = #tpu.pipeline_mode<synchronous>, transform_indices = @transform_1, window_bounds = array<i64: 3072, 256>}, {pipeline_mode = #tpu.pipeline_mode<synchronous>, transform_indices = @transform_2, window_bounds = array<i64: 1, 256>}, {pipeline_mode = #tpu.pipeline_mode<synchronous>, transform_indices = @transform_3, window_bounds = array<i64: 256, 128>}, {pipeline_mode = #tpu.pipeline_mode<synchronous>, transform_indices = @transform_4, window_bounds = array<i64: 1, 128>}, {transform_indices = @transform_5, window_bounds = array<i64: 8, 128>}]} {
    %c0 = arith.constant 0 : index
    %c0_0 = arith.constant 0 : index
    %0 = vector.load %arg1[%c0, %c0_0] : memref<8x3072xf32, #tpu.memory_space<vmem>>, vector<8x3072xf32>
    %1 = arith.truncf %0 : vector<8x3072xf32> to vector<8x3072xbf16>
    %c0_1 = arith.constant 0 : index
    %c0_2 = arith.constant 0 : index
    %2 = vector.load %arg2[%c0_1, %c0_2] : memref<3072x256xbf16, #tpu.memory_space<vmem>>, vector<3072x256xbf16>
    %cst = arith.constant dense<0.000000e+00> : vector<8x256xf32>
    %3 = tpu.matmul %1, %2, %cst {dimension_numbers = #tpu.dot_dimension_numbers<[1], [0], [0], [1], [0, 0, 1, 1], [], []>} : vector<8x3072xbf16>, vector<3072x256xbf16>, vector<8x256xf32> -> vector<8x256xf32>
    %c0_3 = arith.constant 0 : index
    %c0_4 = arith.constant 0 : index
    %4 = vector.load %arg3[%c0_3, %c0_4] : memref<1x256xf32, #tpu.memory_space<vmem>>, vector<1x256xf32>
    %5 = vector.broadcast %4 : vector<1x256xf32> to vector<8x256xf32>
    %6 = arith.addf %3, %5 : vector<8x256xf32>
    %cst_5 = arith.constant 0.000000e+00 : f32
    %7 = vector.broadcast %cst_5 : f32 to vector<8x256xf32>
    %8 = arith.maximumf %6, %7 : vector<8x256xf32>
    %9 = arith.truncf %8 : vector<8x256xf32> to vector<8x256xbf16>
    %c0_6 = arith.constant 0 : index
    %c0_7 = arith.constant 0 : index
    %10 = vector.load %arg4[%c0_6, %c0_7] : memref<256x128xbf16, #tpu.memory_space<vmem>>, vector<256x128xbf16>
    %cst_8 = arith.constant dense<0.000000e+00> : vector<8x128xf32>
    %11 = tpu.matmul %9, %10, %cst_8 {dimension_numbers = #tpu.dot_dimension_numbers<[1], [0], [0], [1], [0, 0, 1, 1], [], []>} : vector<8x256xbf16>, vector<256x128xbf16>, vector<8x128xf32> -> vector<8x128xf32>
    %c0_9 = arith.constant 0 : index
    %c0_10 = arith.constant 0 : index
    %12 = vector.load %arg5[%c0_9, %c0_10] : memref<1x128xf32, #tpu.memory_space<vmem>>, vector<1x128xf32>
    %13 = vector.broadcast %12 : vector<1x128xf32> to vector<8x128xf32>
    %14 = arith.addf %11, %13 : vector<8x128xf32>
    %c0_11 = arith.constant 0 : index
    %c0_12 = arith.constant 0 : index
    %15 = vector.load %arg6[%c0_11, %c0_12] : memref<8x128xf32, #tpu.memory_space<vmem>>, vector<8x128xf32>
    tpu.vector_store %arg6[%c0_11, %c0_12], %14 {strides = array<i32>} : memref<8x128xf32, #tpu.memory_space<vmem>>, vector<8x128xf32>,
    return
  }
  func.func @transform_0(%arg0: i32) -> (i32, i32) {
    %c0_i32 = arith.constant 0 : i32
    %c0_i32_0 = arith.constant 0 : i32
    return %arg0, %c0_i32 : i32, i32
  }
  func.func @transform_1(%arg0: i32) -> (i32, i32) {
    %c0_i32 = arith.constant 0 : i32
    %c0_i32_0 = arith.constant 0 : i32
    %c0_i32_1 = arith.constant 0 : i32
    return %c0_i32, %c0_i32_0 : i32, i32
  }
  func.func @transform_2(%arg0: i32) -> (i32, i32) {
    %c0_i32 = arith.constant 0 : i32
    %c0_i32_0 = arith.constant 0 : i32
    %c0_i32_1 = arith.constant 0 : i32
    return %c0_i32, %c0_i32_0 : i32, i32
  }
  func.func @transform_3(%arg0: i32) -> (i32, i32) {
    %c0_i32 = arith.constant 0 : i32
    %c0_i32_0 = arith.constant 0 : i32
    %c0_i32_1 = arith.constant 0 : i32
    return %c0_i32, %c0_i32_0 : i32, i32
  }
  func.func @transform_4(%arg0: i32) -> (i32, i32) {
    %c0_i32 = arith.constant 0 : i32
    %c0_i32_0 = arith.constant 0 : i32
    %c0_i32_1 = arith.constant 0 : i32
    return %c0_i32, %c0_i32_0 : i32, i32
  }
  func.func @transform_5(%arg0: i32) -> (i32, i32) {
    %c0_i32 = arith.constant 0 : i32
    %c0_i32_0 = arith.constant 0 : i32
    return %arg0, %c0_i32 : i32, i32
  }
}

</mosaic_0001>

<bundles_post_ra>
// kernel: tpu_custom_call.1
= control target key start
LH: loop header
LB: loop body
LE: loop exit
PB: predicated region body
PF: predicated region fallthrough
CT: control target
= control target key end

     0   :  { %10 = vsyncpa [#allocation3], 0  ;;  %s4458_s0 = inlined_call_operand.hbm [shape: f32[8,3072], index: 0, kind: input, shape index: {}]   ;;  %s4459_s1 = inlined_call_operand.hbm [shape: bf16[3072,256], index: 1, kind: input, shape index: {}]   ;;  %s4460_s2 = inlined_call_operand.hbm [shape: f32[1,256], index: 2, kind: input, shape index: {}]   ;;  %s4461_s3 = inlined_call_operand.hbm [shape: bf16[256,128], index: 3, kind: input, shape index: {}]   ;;  %s4462_s4 = inlined_call_operand.hbm [shape: f32[1,128], index: 4, kind: input, shape index: {}]   ;;  %s4463_s5 = inlined_call_operand.hbm [shape: f32[8,128], index: 5, kind: output, shape index: {}]  }
   0x1   :  { %11 = vsyncpa [#allocation6], 0 }
   0x2   :  { %12 = vsyncpa [#allocation9], 0 }
   0x3   :  { %13 = vsyncpa [#allocation4], 0  ;;  %s4346_s18 = smov [#allocation5]   ;;  %s4206_s22 = scalar_lea.hbm %s4459_s1, 49152 }
   0x4   :  { %s29_s19 = sshll.u32 %s4346_s18, 4  ;;  %p4207_p0 = scmp.ne.s32.totalorder %s4459_s1, %s4206_s22  ;;  %s30_s19 = int_to_ptr.vmem [resolvable:$true] %s29_s19 }
   0x5   :  { %p4210_p1 = scmp.lt.u32.totalorder %s4206_s22, %s4459_s1 }
   0x7   :  { %p4212_p2 = pnand %p4210_p1, %p4207_p0 }
   0x9   :  { %4215 = shalt.err (!%p4212_p2)
}
   0xa   :  { %s4216_s27 = scalar_lea.vmem %s30_s19, 49152  ;;  %p4221_p4 = scmp.lt.s32.totalorder %s30_s19, %s30_s19 }
   0xb   :  { %p4217_p3 = scmp.ne.s32.totalorder %s30_s19, %s4216_s27  ;;  %p4222_p5 = scmp.lt.s32.totalorder %s4216_s27, %s4216_s27 }
   0xd   :  { %p4223_p6 = por %p4222_p5, %p4221_p4 }
   0xf   :  { %p4224_p7 = pnand %p4223_p6, %p4217_p3 }
  0x11   :  { %4227 = shalt.err (!%p4224_p7)
}
  0x12   :  { %s4347_s28 = smov 128   ;;  %s4348_s29 = smov 8  }
  0x13   :  { %35 = dma.hbm_to_vmem [thread:$0]  %s4459_s1, 49152, %s30_s19, [#allocation6], %s4347_s28, %s4347_s28, %s4348_s29  }
  0x14   :  { %s4349_s7 = smov [#allocation8]   ;;  %s4228_s11 = scalar_lea.hbm %s4461_s3, 2048 }
  0x15   :  { %s51_s8 = sshll.u32 %s4349_s7, 4  ;;  %p4229_p8 = scmp.ne.s32.totalorder %s4461_s3, %s4228_s11  ;;  %s52_s8 = int_to_ptr.vmem [resolvable:$true] %s51_s8 }
  0x16   :  { %p4232_p9 = scmp.lt.u32.totalorder %s4228_s11, %s4461_s3 }
  0x18   :  { %p4234_p10 = pnand %p4232_p9, %p4229_p8 }
  0x1a   :  { %4237 = shalt.err (!%p4234_p10)
}
  0x1b   :  { %s4238_s16 = scalar_lea.vmem %s52_s8, 2048  ;;  %p4243_p12 = scmp.lt.s32.totalorder %s52_s8, %s52_s8 }
  0x1c   :  { %p4239_p11 = scmp.ne.s32.totalorder %s52_s8, %s4238_s16  ;;  %p4244_p13 = scmp.lt.s32.totalorder %s4238_s16, %s4238_s16 }
  0x1e   :  { %p4245_p0 = por %p4244_p13, %p4243_p12 }
  0x20   :  { %p4246_p1 = pnand %p4245_p0, %p4239_p11 }
  0x22   :  { %4249 = shalt.err (!%p4246_p1)
}
  0x23   :  { %s4350_s1 = smov 64   ;;  %s4351_s17 = smov 4  }
  0x24   :  { %57 = dma.hbm_to_vmem [thread:$0]  %s4461_s3, 2048, %s52_s8, [#allocation9], %s4350_s1, %s4350_s1, %s4351_s17  }
  0x25   :  { %s4352_s20 = smov [#allocation2]   ;;  %s4353_s22 = smov [#allocation7]  }
  0x26   :  { %s20_s21 = sshll.u32 %s4352_s20, 4  ;;  %s42_s23 = sshll.u32 %s4353_s22, 4  ;;  %s21_s21 = int_to_ptr.vmem [resolvable:$true] %s20_s21  ;;  %s43_s23 = int_to_ptr.vmem [resolvable:$true] %s42_s23 }
  0x27   :  { %s4250_s26 = scalar_lea.hbm %s4458_s0, 3072 }
  0x28   :  { %p4251_p2 = scmp.ne.s32.totalorder %s4458_s0, %s4250_s26  ;;  %p4254_p3 = scmp.lt.u32.totalorder %s4250_s26, %s4458_s0 }
  0x2a   :  { %p4256_p4 = pnand %p4254_p3, %p4251_p2 }
  0x2c   :  { %4259 = shalt.err (!%p4256_p4)
}
  0x2d   :  { %s4260_s3 = scalar_lea.vmem %s21_s21, 3072  ;;  %p4265_p6 = scmp.lt.s32.totalorder %s21_s21, %s21_s21 }
  0x2e   :  { %p4261_p5 = scmp.ne.s32.totalorder %s21_s21, %s4260_s3  ;;  %p4266_p7 = scmp.lt.s32.totalorder %s4260_s3, %s4260_s3 }
  0x30   :  { %p4267_p8 = por %p4266_p7, %p4265_p6 }
  0x32   :  { %p4268_p9 = pnand %p4267_p8, %p4261_p5 }
  0x34   :  { %4271 = shalt.err (!%p4268_p9)
}
  0x35   :  { %23 = dma.hbm_to_vmem [thread:$0]  %s4458_s0, 3072, %s21_s21, [#allocation3]  }
  0x36   :  { %s4272_s10 = scalar_lea.hbm %s4460_s2, 32 }
  0x37   :  { %p4273_p10 = scmp.ne.s32.totalorder %s4460_s2, %s4272_s10  ;;  %p4276_p11 = scmp.lt.u32.totalorder %s4272_s10, %s4460_s2 }
  0x39   :  { %p4278_p12 = pnand %p4276_p11, %p4273_p10 }
  0x3b   :  { %4281 = shalt.err (!%p4278_p12)
}
  0x3c   :  { %s4282_s15 = scalar_lea.vmem %s43_s23, 32  ;;  %p4287_p0 = scmp.lt.s32.totalorder %s43_s23, %s43_s23 }
  0x3d   :  { %p4283_p13 = scmp.ne.s32.totalorder %s43_s23, %s4282_s15  ;;  %p4288_p1 = scmp.lt.s32.totalorder %s4282_s15, %s4282_s15 }
  0x3f   :  { %p4289_p2 = por %p4288_p1, %p4287_p0 }
  0x41   :  { %p4290_p3 = pnand %p4289_p2, %p4283_p13 }
  0x43   :  { %4293 = shalt.err (!%p4290_p3)
}
  0x44   :  { %45 = dma.hbm_to_vmem [thread:$0]  %s4460_s2, 32, %s43_s23, [#allocation6]  }
  0x45   :  { %s4354_s1 = smov [#allocation10]   ;;  %s4294_s20 = scalar_lea.hbm %s4462_s4, 16 }
  0x46   :  { %s64_s17 = sshll.u32 %s4354_s1, 4  ;;  %p4295_p4 = scmp.ne.s32.totalorder %s4462_s4, %s4294_s20  ;;  %s65_s17 = int_to_ptr.vmem [resolvable:$true] %s64_s17 }
  0x47   :  { %p4298_p5 = scmp.lt.u32.totalorder %s4294_s20, %s4462_s4 }
  0x49   :  { %p4300_p6 = pnand %p4298_p5, %p4295_p4 }
  0x4b   :  { %4303 = shalt.err (!%p4300_p6)
}
  0x4c   :  { %s4304_s26 = scalar_lea.vmem %s65_s17, 16  ;;  %s4308_s2 = scalar_lea.vmem %s65_s17, 32 }
  0x4d   :  { %p4305_p7 = scmp.ne.s32.totalorder %s65_s17, %s4304_s26  ;;  %p4309_p8 = scmp.lt.s32.totalorder %s65_s17, %s65_s17 }
  0x4e   :  { %p4310_p9 = scmp.lt.s32.totalorder %s4308_s2, %s4304_s26 }
  0x50   :  { %p4311_p10 = por %p4310_p9, %p4309_p8 }
  0x52   :  { %p4312_p11 = pnand %p4311_p10, %p4305_p7 }
  0x54   :  { %4315 = shalt.err (!%p4312_p11)
}
  0x55   :  { %67 = dma.hbm_to_vmem [thread:$0]  %s4462_s4, 16, %s65_s17, [#allocation9]  }
  0x56   :  { %4338 = dma.done.wait [#allocation3], 3072  }
  0x57   :  { %4339 = vsyncadd [#allocation3], 4294964224 }
  0x58   :  { %4340 = dma.done.wait [#allocation6], 49184  }
  0x59   :  { %4341 = vsyncadd [#allocation6], 4294918112 }
  0x5a   :  { %4342 = dma.done.wait [#allocation9], 2064  }
  0x5b   :  { %4343 = vsyncadd [#allocation9], 4294965232  ;;  %v3614_v0 = vld [vmem:[#allocation5 + $0x4] ss:$8 sps:$4 sm:$0xff]   ;;  %v3618_v2 = vld [vmem:[#allocation5] ss:$8 sps:$4 sm:$0xff]  }
  0x5c   :  { %v3616_v1 = vld [vmem:[#allocation5 + $0x604] ss:$8 sps:$4 sm:$0xff]   ;;  %2448 = vmatprep.subr.bf16.mxu1 %v3614_v0  ;;  %v3619_v3 = vld [vmem:[#allocation5 + $0x600] ss:$8 sps:$4 sm:$0xff]   ;;  %v3620_v4 = vld [vmem:[#allocation5 + $0x14] ss:$8 sps:$4 sm:$0xff]  }
  0x5d   :  { %2694 = vmatprep.subr.bf16.mxu0 %v3616_v1  ;;  %2449 = vmatpush1.bf16.msra.mxu1 %v3618_v2  ;;  %v3622_v5 = vld [vmem:[#allocation5 + $0x614] ss:$8 sps:$4 sm:$0xff]   ;;  %v3624_v6 = vld [vmem:[#allocation5 + $0x10] ss:$8 sps:$4 sm:$0xff]   ;;  %v3626_v8 = vld [vmem:[#allocation5 + $0x24] ss:$8 sps:$4 sm:$0xff]  }
  0x5e   :  { %2695 = vmatpush1.bf16.msra.mxu0 %v3619_v3  ;;  %2450 = vmatprep.subr.bf16.mxu1 %v3620_v4  ;;  %v3625_v7 = vld [vmem:[#allocation5 + $0x610] ss:$8 sps:$4 sm:$0xff]   ;;  %v3628_v9 = vld [vmem:[#allocation5 + $0x624] ss:$8 sps:$4 sm:$0xff]   ;;  %v3630_v10 = vld [vmem:[#allocation5 + $0x20] ss:$8 sps:$4 sm:$0xff]  }
  0x5f   :  { %2696 = vmatprep.subr.bf16.mxu0 %v3622_v5  ;;  %v3631_v11 = vld [vmem:[#allocation5 + $0x620] ss:$8 sps:$4 sm:$0xff]   ;;  %v3632_v12 = vld [vmem:[#allocation5 + $0x34] ss:$8 sps:$4 sm:$0xff]   ;;  %v3636_v14 = vld [vmem:[#allocation5 + $0x30] ss:$8 sps:$4 sm:$0xff]  }
  0x60   :  { %v3634_v13 = vld [vmem:[#allocation5 + $0x634] ss:$8 sps:$4 sm:$0xff]   ;;  %v3637_v15 = vld [vmem:[#allocation5 + $0x630] ss:$8 sps:$4 sm:$0xff]   ;;  %v3638_v16 = vld [vmem:[#allocation5 + $0x44] ss:$8 sps:$4 sm:$0xff]  }
  0x61   :  { %2451 = vmatpush1.bf16.msra.mxu1 %v3624_v6  ;;  %v3640_v17 = vld [vmem:[#allocation5 + $0x644] ss:$8 sps:$4 sm:$0xff]   ;;  %v3642_v18 = vld [vmem:[#allocation5 + $0x40] ss:$8 sps:$4 sm:$0xff]   ;;  %v3644_v20 = vld [vmem:[#allocation5 + $0x54] ss:$8 sps:$4 sm:$0xff]  }
  0x62   :  { %2697 = vmatpush1.bf16.msra.mxu0 %v3625_v7  ;;  %2452 = vmatprep.subr.bf16.mxu1 %v3626_v8  ;;  %v3643_v19 = vld [vmem:[#allocation5 + $0x640] ss:$8 sps:$4 sm:$0xff]   ;;  %v3646_v21 = vld [vmem:[#allocation5 + $0x654] ss:$8 sps:$4 sm:$0xff]   ;;  %v3648_v22 = vld [vmem:[#allocation5 + $0x50] ss:$8 sps:$4 sm:$0xff]  }
  0x63   :  { %2698 = vmatprep.subr.bf16.mxu0 %v3628_v9  ;;  %v3649_v23 = vld [vmem:[#allocation5 + $0x650] ss:$8 sps:$4 sm:$0xff]   ;;  %v3650_v24 = vld [vmem:[#allocation5 + $0x64] ss:$8 sps:$4 sm:$0xff]   ;;  %v3654_v26 = vld [vmem:[#allocation5 + $0x60] ss:$8 sps:$4 sm:$0xff]  }
  0x64   :  { %v3652_v25 = vld [vmem:[#allocation5 + $0x664] ss:$8 sps:$4 sm:$0xff]   ;;  %v3655_v27 = vld [vmem:[#allocation5 + $0x660] ss:$8 sps:$4 sm:$0xff]   ;;  %v3656_v28 = vld [vmem:[#allocation5 + $0x74] ss:$8 sps:$4 sm:$0xff]  }
  0x65   :  { %2453 = vmatpush1.bf16.msra.mxu1 %v3630_v10  ;;  %v3658_v29 = vld [vmem:[#allocation5 + $0x674] ss:$8 sps:$4 sm:$0xff]   ;;  %v3660_v30 = vld [vmem:[#allocation5 + $0x70] ss:$8 sps:$4 sm:$0xff]   ;;  %v3662_v32 = vld [vmem:[#allocation5 + $0x84] ss:$8 sps:$4 sm:$0xff]  }
  0x66   :  { %2699 = vmatpush1.bf16.msra.mxu0 %v3631_v11  ;;  %2454 = vmatprep.subr.bf16.mxu1 %v3632_v12  ;;  %v3661_v31 = vld [vmem:[#allocation5 + $0x670] ss:$8 sps:$4 sm:$0xff]   ;;  %v3664_v33 = vld [vmem:[#allocation5 + $0x684] ss:$8 sps:$4 sm:$0xff]   ;;  %v3666_v34 = vld [vmem:[#allocation5 + $0x80] ss:$8 sps:$4 sm:$0xff]  }
  0x67   :  { %2700 = vmatprep.subr.bf16.mxu0 %v3634_v13  ;;  %v3667_v35 = vld [vmem:[#allocation5 + $0x680] ss:$8 sps:$4 sm:$0xff]   ;;  %v3668_v36 = vld [vmem:[#allocation5 + $0x94] ss:$8 sps:$4 sm:$0xff]   ;;  %v3672_v38 = vld [vmem:[#allocation5 + $0x90] ss:$8 sps:$4 sm:$0xff]  }
  0x68   :  { %v3670_v37 = vld [vmem:[#allocation5 + $0x694] ss:$8 sps:$4 sm:$0xff]   ;;  %v3673_v39 = vld [vmem:[#allocation5 + $0x690] ss:$8 sps:$4 sm:$0xff]   ;;  %v3674_v40 = vld [vmem:[#allocation5 + $0xa4] ss:$8 sps:$4 sm:$0xff]  }
  0x69   :  { %2455 = vmatpush1.bf16.msra.mxu1 %v3636_v14  ;;  %v3676_v41 = vld [vmem:[#allocation5 + $0x6a4] ss:$8 sps:$4 sm:$0xff]   ;;  %v3678_v42 = vld [vmem:[#allocation5 + $0xa0] ss:$8 sps:$4 sm:$0xff]   ;;  %v3680_v44 = vld [vmem:[#allocation5 + $0xb4] ss:$8 sps:$4 sm:$0xff]  }
  0x6a   :  { %2701 = vmatpush1.bf16.msra.mxu0 %v3637_v15  ;;  %2456 = vmatprep.subr.bf16.mxu1 %v3638_v16  ;;  %v3679_v43 = vld [vmem:[#allocation5 + $0x6a0] ss:$8 sps:$4 sm:$0xff]   ;;  %v3682_v45 = vld [vmem:[#allocation5 + $0x6b4] ss:$8 sps:$4 sm:$0xff]   ;;  %v3684_v47 = vld [vmem:[#allocation5 + $0xb0] ss:$8 sps:$4 sm:$0xff]  }
  0x6b   :  { %2702 = vmatprep.subr.bf16.mxu0 %v3640_v17  ;;  %v85_v46 = vld [vmem:[#allocation2 + $0x8] sm:$0xff]  ;;  %v3685_v49 = vld [vmem:[#allocation5 + $0x6b0] ss:$8 sps:$4 sm:$0xff]   ;;  %v3692_v56 = vld [vmem:[#allocation5 + $0xd4] ss:$8 sps:$4 sm:$0xff]   ;;  %s4355_s4 = smov [#allocation11]  }
  0x6c   :  { %v109_v48 = vpack.c.bf16 %v85_v46, %v85_v46  ;;  %v97_v50 = vld [vmem:[#allocation2 + $0x68] sm:$0xff]  ;;  %v3694_v57 = vld [vmem:[#allocation5 + $0x6d4] ss:$8 sps:$4 sm:$0xff]   ;;  %v3696_v58 = vld [vmem:[#allocation5 + $0xd0] ss:$8 sps:$4 sm:$0xff]   ;;  %s3126_s28 = sshll.u32 %s4355_s4, 4  ;;  %s3127_s28 = int_to_ptr.vmem [resolvable:$true] %s3126_s28 }
  0x6d   :  { %2457 = vmatpush1.bf16.msra.mxu1 %v3642_v18  ;;  %v3686_v51 = vld [vmem:[#allocation5 + $0xc4] ss:$8 sps:$4 sm:$0xff]   ;;  %v121_v53 = vpack.c.bf16 %v97_v50, %v97_v50  ;;  %v3690_v54 = vld [vmem:[#allocation5 + $0xc0] ss:$8 sps:$4 sm:$0xff]   ;;  %v3697_v59 = vld [vmem:[#allocation5 + $0x6d0] ss:$8 sps:$4 sm:$0xff]   ;;  %p4321_p13 = scmp.lt.s32.totalorder %s3127_s28, %s3127_s28 }
  0x6e   :  { %2703 = vmatpush1.bf16.msra.mxu0 %v3643_v19  ;;  %2458 = vmatprep.subr.bf16.mxu1 %v3644_v20  ;;  %v3688_v52 = vld [vmem:[#allocation5 + $0x6c4] ss:$8 sps:$4 sm:$0xff]   ;;  %v3691_v55 = vld [vmem:[#allocation5 + $0x6c0] ss:$8 sps:$4 sm:$0xff]   ;;  %v3704_v0 = vld [vmem:[#allocation5 + $0xf4] ss:$8 sps:$4 sm:$0xff]  }
  0x6f   :  { %2704 = vmatprep.subr.bf16.mxu0 %v3646_v21  ;;  %2480 = vmatprep.mubr.bf16.mxu1 %v109_v48  ;;  %v3698_v60 = vld [vmem:[#allocation5 + $0xe4] ss:$8 sps:$4 sm:$0xff]   ;;  %v3702_v62 = vld [vmem:[#allocation5 + $0xe0] ss:$8 sps:$4 sm:$0xff]   ;;  %v3706_v1 = vld [vmem:[#allocation5 + $0x6f4] ss:$8 sps:$4 sm:$0xff]  }
  0x70   :  { %2726 = vmatprep.mubr.bf16.mxu0 %v121_v53  ;;  %v3700_v61 = vld [vmem:[#allocation5 + $0x6e4] ss:$8 sps:$4 sm:$0xff]   ;;  %v3703_v63 = vld [vmem:[#allocation5 + $0x6e0] ss:$8 sps:$4 sm:$0xff]   ;;  %v3708_v2 = vld [vmem:[#allocation5 + $0xf0] ss:$8 sps:$4 sm:$0xff]  }
  0x71   :  { %2459 = vmatpush1.bf16.msra.mxu1 %v3648_v22  ;;  %v3709_v3 = vld [vmem:[#allocation5 + $0x6f0] ss:$8 sps:$4 sm:$0xff]   ;;  %v3712_v4 = vld [vmem:[#allocation5 + $0x104] ss:$8 sps:$4 sm:$0xff]   ;;  %v3710_v8 = vld [vmem:[#allocation5 + $0x100] ss:$8 sps:$4 sm:$0xff]  }
  0x72   :  { %2705 = vmatpush1.bf16.msra.mxu0 %v3649_v23  ;;  %2460 = vmatprep.subr.bf16.mxu1 %v3650_v24  ;;  %v84_v5 = vld [vmem:[#allocation2] sm:$0xff]  ;;  %v3718_v12 = vld [vmem:[#allocation5 + $0x114] ss:$8 sps:$4 sm:$0xff]   ;;  %v3716_v14 = vld [vmem:[#allocation5 + $0x110] ss:$8 sps:$4 sm:$0xff]   ;;  %s4316_s29 = scalar_lea.vmem %s3127_s28, 128 }
  0x73   :  { %2706 = vmatprep.subr.bf16.mxu0 %v3652_v25  ;;  %v96_v6 = vld [vmem:[#allocation2 + $0x60] sm:$0xff]  ;;  %v108_v10 = vpack.c.bf16 %v84_v5, %v84_v5  ;;  %v3721_v13 = vld [vmem:[#allocation5 + $0x714] ss:$8 sps:$4 sm:$0xff]   ;;  %v3719_v15 = vld [vmem:[#allocation5 + $0x710] ss:$8 sps:$4 sm:$0xff]   ;;  %p4317_p12 = scmp.ne.s32.totalorder %s3127_s28, %s4316_s29  ;;  %p4322_p0 = scmp.lt.s32.totalorder %s4316_s29, %s4316_s29 }
  0x74   :  { %v3715_v7 = vld [vmem:[#allocation5 + $0x704] ss:$8 sps:$4 sm:$0xff]   ;;  %v3713_v9 = vld [vmem:[#allocation5 + $0x700] ss:$8 sps:$4 sm:$0xff]   ;;  %v120_v11 = vpack.c.bf16 %v96_v6, %v96_v6  ;;  %v3730_v20 = vld [vmem:[#allocation5 + $0x134] ss:$8 sps:$4 sm:$0xff]  }
  0x75   :  { %2461 = vmatpush1.bf16.msra.mxu1 %v3654_v26  ;;  %v3724_v16 = vld [vmem:[#allocation5 + $0x124] ss:$8 sps:$4 sm:$0xff]   ;;  %v3722_v18 = vld [vmem:[#allocation5 + $0x120] ss:$8 sps:$4 sm:$0xff]   ;;  %v3733_v21 = vld [vmem:[#allocation5 + $0x734] ss:$8 sps:$4 sm:$0xff]   ;;  %p4323_p1 = por %p4322_p0, %p4321_p13 }
  0x76   :  { %2707 = vmatpush1.bf16.msra.mxu0 %v3655_v27  ;;  %2462 = vmatprep.subr.bf16.mxu1 %v3656_v28  ;;  %v3727_v17 = vld [vmem:[#allocation5 + $0x724] ss:$8 sps:$4 sm:$0xff]   ;;  %v3725_v19 = vld [vmem:[#allocation5 + $0x720] ss:$8 sps:$4 sm:$0xff]   ;;  %v3728_v22 = vld [vmem:[#allocation5 + $0x130] ss:$8 sps:$4 sm:$0xff]  }
  0x77   :  { %2708 = vmatprep.subr.bf16.mxu0 %v3658_v29  ;;  %v3731_v23 = vld [vmem:[#allocation5 + $0x730] ss:$8 sps:$4 sm:$0xff]   ;;  %v3736_v24 = vld [vmem:[#allocation5 + $0x144] ss:$8 sps:$4 sm:$0xff]   ;;  %v3734_v26 = vld [vmem:[#allocation5 + $0x140] ss:$8 sps:$4 sm:$0xff]   ;;  %p4324_p2 = pnand %p4323_p1, %p4317_p12 }
  0x78   :  { %v3739_v25 = vld [vmem:[#allocation5 + $0x744] ss:$8 sps:$4 sm:$0xff]   ;;  %v3737_v27 = vld [vmem:[#allocation5 + $0x740] ss:$8 sps:$4 sm:$0xff]   ;;  %v3742_v28 = vld [vmem:[#allocation5 + $0x154] ss:$8 sps:$4 sm:$0xff]  }
  0x79   :  { %2463 = vmatpush1.bf16.msra.mxu1 %v3660_v30  ;;  %v3745_v29 = vld [vmem:[#allocation5 + $0x754] ss:$8 sps:$4 sm:$0xff]   ;;  %v3740_v30 = vld [vmem:[#allocation5 + $0x150] ss:$8 sps:$4 sm:$0xff]   ;;  %v3758_v46 = vld [vmem:[#allocation5 + $0x180] ss:$8 sps:$4 sm:$0xff]  }
  0x7a   :  { %2709 = vmatpush1.bf16.msra.mxu0 %v3661_v31  ;;  %2464 = vmatprep.subr.bf16.mxu1 %v3662_v32  ;;  %v3743_v31 = vld [vmem:[#allocation5 + $0x750] ss:$8 sps:$4 sm:$0xff]   ;;  %v3748_v32 = vld [vmem:[#allocation5 + $0x164] ss:$8 sps:$4 sm:$0xff]   ;;  %v3766_v48 = vld [vmem:[#allocation5 + $0x194] ss:$8 sps:$4 sm:$0xff]  }
  0x7b   :  { %2710 = vmatprep.subr.bf16.mxu0 %v3664_v33  ;;  %v3751_v33 = vld [vmem:[#allocation5 + $0x764] ss:$8 sps:$4 sm:$0xff]   ;;  %v3764_v50 = vld [vmem:[#allocation5 + $0x190] ss:$8 sps:$4 sm:$0xff]   ;;  %v3794_v6 = vld [vmem:[#allocation5 + $0x1e0] ss:$8 sps:$4 sm:$0xff]  }
  0x7c   :  { %v3775_v53 = vld [vmem:[#allocation5 + $0x7a4] ss:$8 sps:$4 sm:$0xff]  }
  0x7d   :  { %2465 = vmatpush1.bf16.msra.mxu1 %v3666_v34  ;;  %v87_v34 = vld [vmem:[#allocation2 + $0x18] sm:$0xff]  ;;  %v3799_v5 = vld [vmem:[#allocation5 + $0x7e4] ss:$8 sps:$4 sm:$0xff]  }
  0x7e   :  { %2711 = vmatpush1.bf16.msra.mxu0 %v3667_v35  ;;  %2466 = vmatprep.subr.bf16.mxu1 %v3668_v36  ;;  %v3746_v35 = vld [vmem:[#allocation5 + $0x160] ss:$8 sps:$4 sm:$0xff]   ;;  %v111_v36 = vpack.c.bf16 %v87_v34, %v87_v34  ;;  %v3824_v34 = vld [vmem:[#allocation5 + $0x230] ss:$8 sps:$4 sm:$0xff]  }
  0x7f   :  { %2712 = vmatprep.subr.bf16.mxu0 %v3670_v37  ;;  %v3749_v37 = vld [vmem:[#allocation5 + $0x760] ss:$8 sps:$4 sm:$0xff]  }
  0x81   :  { %2467 = vmatpush1.bf16.msra.mxu1 %v3672_v38  ;;  %v99_v38 = vld [vmem:[#allocation2 + $0x78] sm:$0xff] }
  0x82   :  { %2713 = vmatpush1.bf16.msra.mxu0 %v3673_v39  ;;  %2468 = vmatprep.subr.bf16.mxu1 %v3674_v40  ;;  %v3754_v39 = vld [vmem:[#allocation5 + $0x174] ss:$8 sps:$4 sm:$0xff]  }
  0x83   :  { %2714 = vmatprep.subr.bf16.mxu0 %v3676_v41  ;;  %v3757_v40 = vld [vmem:[#allocation5 + $0x774] ss:$8 sps:$4 sm:$0xff]   ;;  %v123_v41 = vpack.c.bf16 %v99_v38, %v99_v38  ;;  %v3830_v38 = vld [vmem:[#allocation5 + $0x240] ss:$8 sps:$4 sm:$0xff]  }
  0x85   :  { %2469 = vmatpush1.bf16.msra.mxu1 %v3678_v42  ;;  %v3752_v42 = vld [vmem:[#allocation5 + $0x170] ss:$8 sps:$4 sm:$0xff]  }
  0x86   :  { %2715 = vmatpush1.bf16.msra.mxu0 %v3679_v43  ;;  %2470 = vmatprep.subr.bf16.mxu1 %v3680_v44  ;;  %v3755_v43 = vld [vmem:[#allocation5 + $0x770] ss:$8 sps:$4 sm:$0xff]   ;;  %v3760_v44 = vld [vmem:[#allocation5 + $0x184] ss:$8 sps:$4 sm:$0xff]  }
  0x87   :  { %2716 = vmatprep.subr.bf16.mxu0 %v3682_v45  ;;  %v3763_v45 = vld [vmem:[#allocation5 + $0x784] ss:$8 sps:$4 sm:$0xff]  }
  0x89   :  { %2471 = vmatpush1.bf16.msra.mxu1 %v3684_v47  ;;  %v3761_v47 = vld [vmem:[#allocation5 + $0x780] ss:$8 sps:$4 sm:$0xff]  }
  0x8a   :  { %2717 = vmatpush1.bf16.msra.mxu0 %v3685_v49  ;;  %2472 = vmatprep.subr.bf16.mxu1 %v3686_v51  ;;  %v3769_v49 = vld [vmem:[#allocation5 + $0x794] ss:$8 sps:$4 sm:$0xff]   ;;  %v3767_v51 = vld [vmem:[#allocation5 + $0x790] ss:$8 sps:$4 sm:$0xff]  }
  0x8b   :  { %2718 = vmatprep.subr.bf16.mxu0 %v3688_v52  ;;  %v3772_v52 = vld [vmem:[#allocation5 + $0x1a4] ss:$8 sps:$4 sm:$0xff]  }
  0x8d   :  { %2473 = vmatpush1.bf16.msra.mxu1 %v3690_v54  ;;  %v3770_v54 = vld [vmem:[#allocation5 + $0x1a0] ss:$8 sps:$4 sm:$0xff]  }
  0x8e   :  { %2719 = vmatpush1.bf16.msra.mxu0 %v3691_v55  ;;  %2474 = vmatprep.subr.bf16.mxu1 %v3692_v56  ;;  %v3773_v55 = vld [vmem:[#allocation5 + $0x7a0] ss:$8 sps:$4 sm:$0xff]   ;;  %v3778_v56 = vld [vmem:[#allocation5 + $0x1b4] ss:$8 sps:$4 sm:$0xff]  }
  0x8f   :  { %2720 = vmatprep.subr.bf16.mxu0 %v3694_v57  ;;  %v3781_v57 = vld [vmem:[#allocation5 + $0x7b4] ss:$8 sps:$4 sm:$0xff]  }
  0x91   :  { %2475 = vmatpush1.bf16.msra.mxu1 %v3696_v58  ;;  %v3776_v58 = vld [vmem:[#allocation5 + $0x1b0] ss:$8 sps:$4 sm:$0xff]  }
  0x92   :  { %2721 = vmatpush1.bf16.msra.mxu0 %v3697_v59  ;;  %2476 = vmatprep.subr.bf16.mxu1 %v3698_v60  ;;  %v3779_v59 = vld [vmem:[#allocation5 + $0x7b0] ss:$8 sps:$4 sm:$0xff]   ;;  %v3784_v60 = vld [vmem:[#allocation5 + $0x1c4] ss:$8 sps:$4 sm:$0xff]  }
  0x93   :  { %2722 = vmatprep.subr.bf16.mxu0 %v3700_v61  ;;  %v3787_v61 = vld [vmem:[#allocation5 + $0x7c4] ss:$8 sps:$4 sm:$0xff]  }
  0x95   :  { %2477 = vmatpush1.bf16.msra.mxu1 %v3702_v62  ;;  %v3782_v62 = vld [vmem:[#allocation5 + $0x1c0] ss:$8 sps:$4 sm:$0xff]  }
  0x96   :  { %2723 = vmatpush1.bf16.msra.mxu0 %v3703_v63  ;;  %2478 = vmatprep.subr.bf16.mxu1 %v3704_v0  ;;  %v3785_v63 = vld [vmem:[#allocation5 + $0x7c0] ss:$8 sps:$4 sm:$0xff]   ;;  %v3790_v0 = vld [vmem:[#allocation5 + $0x1d4] ss:$8 sps:$4 sm:$0xff]  }
  0x97   :  { %2724 = vmatprep.subr.bf16.mxu0 %v3706_v1  ;;  %v3793_v1 = vld [vmem:[#allocation5 + $0x7d4] ss:$8 sps:$4 sm:$0xff]  }
  0x99   :  { %2479 = vmatpush1.bf16.msra.mxu1 %v3708_v2  ;;  %v3788_v2 = vld [vmem:[#allocation5 + $0x1d0] ss:$8 sps:$4 sm:$0xff]  }
  0x9a   :  { %2725 = vmatpush1.bf16.msra.mxu0 %v3709_v3  ;;  %2489 = vmatprep.subr.bf16.mxu1 %v3712_v4  ;;  %v3791_v3 = vld [vmem:[#allocation5 + $0x7d0] ss:$8 sps:$4 sm:$0xff]   ;;  %v3796_v4 = vld [vmem:[#allocation5 + $0x1e4] ss:$8 sps:$4 sm:$0xff]  }
  0x9b   :  { %2735 = vmatprep.subr.bf16.mxu0 %v3715_v7  ;;  %v3797_v7 = vld [vmem:[#allocation5 + $0x7e0] ss:$8 sps:$4 sm:$0xff]  }
  0x9c   :  { %2481 = vmatmul.mubr.bf16.vlgmr.msra.gmra.mrb[0].mxu1 %v108_v10  ;;  %v3800_v10 = vld [vmem:[#allocation5 + $0x1f0] ss:$8 sps:$4 sm:$0xff]  }
  0x9d   :  { %2727 = vmatmul.mubr.bf16.vlgmr.msra.gmra.mrb[0].mxu0 %v120_v11  ;;  %2490 = vmatpush1.bf16.msra.mxu1 %v3710_v8  ;;  %v3802_v8 = vld [vmem:[#allocation5 + $0x1f4] ss:$8 sps:$4 sm:$0xff]   ;;  %v3803_v11 = vld [vmem:[#allocation5 + $0x7f0] ss:$8 sps:$4 sm:$0xff]  }
  0x9e   :  { %2736 = vmatpush1.bf16.msra.mxu0 %v3713_v9  ;;  %2491 = vmatprep.subr.bf16.mxu1 %v3718_v12  ;;  %v3805_v9 = vld [vmem:[#allocation5 + $0x7f4] ss:$8 sps:$4 sm:$0xff]   ;;  %v3808_v12 = vld [vmem:[#allocation5 + $0x204] ss:$8 sps:$4 sm:$0xff]  }
  0x9f   :  { %2737 = vmatprep.subr.bf16.mxu0 %v3721_v13  ;;  %2521 = vmatprep.mubr.bf16.mxu1 %v111_v36  ;;  %v86_v13 = vld [vmem:[#allocation2 + $0x10] sm:$0xff]  ;;  %v3832_v36 = vld [vmem:[#allocation5 + $0x244] ss:$8 sps:$4 sm:$0xff]  }
  0xa0   :  { %2767 = vmatprep.mubr.bf16.mxu0 %v123_v41  ;;  %v3841_v41 = vld [vmem:[#allocation5 + $0x854] ss:$8 sps:$4 sm:$0xff]  }
  0xa1   :  { %2492 = vmatpush1.bf16.msra.mxu1 %v3716_v14  ;;  %v98_v14 = vld [vmem:[#allocation2 + $0x70] sm:$0xff] }
  0xa2   :  { %2738 = vmatpush1.bf16.msra.mxu0 %v3719_v15  ;;  %2493 = vmatprep.subr.bf16.mxu1 %v3724_v16  ;;  %v3811_v15 = vld [vmem:[#allocation5 + $0x804] ss:$8 sps:$4 sm:$0xff]   ;;  %v3806_v16 = vld [vmem:[#allocation5 + $0x200] ss:$8 sps:$4 sm:$0xff]  }
  0xa3   :  { %2739 = vmatprep.subr.bf16.mxu0 %v3727_v17  ;;  %v3809_v17 = vld [vmem:[#allocation5 + $0x800] ss:$8 sps:$4 sm:$0xff]  }
  0xa5   :  { %2494 = vmatpush1.bf16.msra.mxu1 %v3722_v18  ;;  %v110_v18 = vpack.c.bf16 %v86_v13, %v86_v13  ;;  %v3895_v13 = vld [vmem:[#allocation5 + $0x8e4] ss:$8 sps:$4 sm:$0xff]  }
  0xa6   :  { %2740 = vmatpush1.bf16.msra.mxu0 %v3725_v19  ;;  %2495 = vmatprep.subr.bf16.mxu1 %v3730_v20  ;;  %v122_v19 = vpack.c.bf16 %v98_v14, %v98_v14  ;;  %v3814_v20 = vld [vmem:[#allocation5 + $0x214] ss:$8 sps:$4 sm:$0xff]   ;;  %v3890_v14 = vld [vmem:[#allocation5 + $0x2e0] ss:$8 sps:$4 sm:$0xff]  }
  0xa7   :  { %2741 = vmatprep.subr.bf16.mxu0 %v3733_v21  ;;  %v3817_v21 = vld [vmem:[#allocation5 + $0x814] ss:$8 sps:$4 sm:$0xff]  }
  0xa9   :  { %2496 = vmatpush1.bf16.msra.mxu1 %v3728_v22  ;;  %v89_v22 = vld [vmem:[#allocation2 + $0x28] sm:$0xff] }
  0xaa   :  { %2742 = vmatpush1.bf16.msra.mxu0 %v3731_v23  ;;  %2497 = vmatprep.subr.bf16.mxu1 %v3736_v24  ;;  %v3812_v23 = vld [vmem:[#allocation5 + $0x210] ss:$8 sps:$4 sm:$0xff]   ;;  %v113_v24 = vpack.c.bf16 %v89_v22, %v89_v22  ;;  %v100_v22 = vld [vmem:[#allocation2 + $0x80] sm:$0xff] }
  0xab   :  { %2743 = vmatprep.subr.bf16.mxu0 %v3739_v25  ;;  %v3815_v25 = vld [vmem:[#allocation5 + $0x810] ss:$8 sps:$4 sm:$0xff]  }
  0xad   :  { %2498 = vmatpush1.bf16.msra.mxu1 %v3734_v26  ;;  %v101_v26 = vld [vmem:[#allocation2 + $0x88] sm:$0xff] }
  0xae   :  { %2744 = vmatpush1.bf16.msra.mxu0 %v3737_v27  ;;  %2499 = vmatprep.subr.bf16.mxu1 %v3742_v28  ;;  %v3820_v27 = vld [vmem:[#allocation5 + $0x224] ss:$8 sps:$4 sm:$0xff]  }
  0xaf   :  { %2745 = vmatprep.subr.bf16.mxu0 %v3745_v29  ;;  %v3823_v28 = vld [vmem:[#allocation5 + $0x824] ss:$8 sps:$4 sm:$0xff]   ;;  %v125_v29 = vpack.c.bf16 %v101_v26, %v101_v26 }
  0xb1   :  { %2500 = vmatpush1.bf16.msra.mxu1 %v3740_v30  ;;  %v3818_v30 = vld [vmem:[#allocation5 + $0x220] ss:$8 sps:$4 sm:$0xff]  }
  0xb2   :  { %2746 = vmatpush1.bf16.msra.mxu0 %v3743_v31  ;;  %2501 = vmatprep.subr.bf16.mxu1 %v3748_v32  ;;  %v3821_v31 = vld [vmem:[#allocation5 + $0x820] ss:$8 sps:$4 sm:$0xff]   ;;  %v3826_v32 = vld [vmem:[#allocation5 + $0x234] ss:$8 sps:$4 sm:$0xff]  }
  0xb3   :  { %2747 = vmatprep.subr.bf16.mxu0 %v3751_v33  ;;  %v3829_v33 = vld [vmem:[#allocation5 + $0x834] ss:$8 sps:$4 sm:$0xff]  }
  0xb5   :  { %2502 = vmatpush1.bf16.msra.mxu1 %v3746_v35  ;;  %v3827_v35 = vld [vmem:[#allocation5 + $0x830] ss:$8 sps:$4 sm:$0xff]  }
  0xb6   :  { %2748 = vmatpush1.bf16.msra.mxu0 %v3749_v37  ;;  %2503 = vmatprep.subr.bf16.mxu1 %v3754_v39  ;;  %v3835_v37 = vld [vmem:[#allocation5 + $0x844] ss:$8 sps:$4 sm:$0xff]   ;;  %v3833_v39 = vld [vmem:[#allocation5 + $0x840] ss:$8 sps:$4 sm:$0xff]  }
  0xb7   :  { %2749 = vmatprep.subr.bf16.mxu0 %v3757_v40  ;;  %v3838_v40 = vld [vmem:[#allocation5 + $0x254] ss:$8 sps:$4 sm:$0xff]  }
  0xb9   :  { %2504 = vmatpush1.bf16.msra.mxu1 %v3752_v42  ;;  %v3836_v42 = vld [vmem:[#allocation5 + $0x250] ss:$8 sps:$4 sm:$0xff]  }
  0xba   :  { %2750 = vmatpush1.bf16.msra.mxu0 %v3755_v43  ;;  %2505 = vmatprep.subr.bf16.mxu1 %v3760_v44  ;;  %v3839_v43 = vld [vmem:[#allocation5 + $0x850] ss:$8 sps:$4 sm:$0xff]   ;;  %v3844_v44 = vld [vmem:[#allocation5 + $0x264] ss:$8 sps:$4 sm:$0xff]  }
  0xbb   :  { %2751 = vmatprep.subr.bf16.mxu0 %v3763_v45  ;;  %v3847_v45 = vld [vmem:[#allocation5 + $0x864] ss:$8 sps:$4 sm:$0xff]  }
  0xbd   :  { %2506 = vmatpush1.bf16.msra.mxu1 %v3758_v46  ;;  %v3842_v46 = vld [vmem:[#allocation5 + $0x260] ss:$8 sps:$4 sm:$0xff]  }
  0xbe   :  { %2752 = vmatpush1.bf16.msra.mxu0 %v3761_v47  ;;  %2507 = vmatprep.subr.bf16.mxu1 %v3766_v48  ;;  %v3845_v47 = vld [vmem:[#allocation5 + $0x860] ss:$8 sps:$4 sm:$0xff]   ;;  %v3850_v48 = vld [vmem:[#allocation5 + $0x274] ss:$8 sps:$4 sm:$0xff]  }
  0xbf   :  { %2753 = vmatprep.subr.bf16.mxu0 %v3769_v49  ;;  %v3853_v49 = vld [vmem:[#allocation5 + $0x874] ss:$8 sps:$4 sm:$0xff]  }
  0xc1   :  { %2508 = vmatpush1.bf16.msra.mxu1 %v3764_v50  ;;  %v3848_v50 = vld [vmem:[#allocation5 + $0x270] ss:$8 sps:$4 sm:$0xff]  }
  0xc2   :  { %2754 = vmatpush1.bf16.msra.mxu0 %v3767_v51  ;;  %2509 = vmatprep.subr.bf16.mxu1 %v3772_v52  ;;  %v3851_v51 = vld [vmem:[#allocation5 + $0x870] ss:$8 sps:$4 sm:$0xff]   ;;  %v3856_v52 = vld [vmem:[#allocation5 + $0x284] ss:$8 sps:$4 sm:$0xff]  }
  0xc3   :  { %2755 = vmatprep.subr.bf16.mxu0 %v3775_v53  ;;  %v3859_v53 = vld [vmem:[#allocation5 + $0x884] ss:$8 sps:$4 sm:$0xff]  }
  0xc5   :  { %2510 = vmatpush1.bf16.msra.mxu1 %v3770_v54  ;;  %v3854_v54 = vld [vmem:[#allocation5 + $0x280] ss:$8 sps:$4 sm:$0xff]  }
  0xc6   :  { %2756 = vmatpush1.bf16.msra.mxu0 %v3773_v55  ;;  %2511 = vmatprep.subr.bf16.mxu1 %v3778_v56  ;;  %v3857_v55 = vld [vmem:[#allocation5 + $0x880] ss:$8 sps:$4 sm:$0xff]   ;;  %v3862_v56 = vld [vmem:[#allocation5 + $0x294] ss:$8 sps:$4 sm:$0xff]  }
  0xc7   :  { %2757 = vmatprep.subr.bf16.mxu0 %v3781_v57  ;;  %v3865_v57 = vld [vmem:[#allocation5 + $0x894] ss:$8 sps:$4 sm:$0xff]  }
  0xc9   :  { %2512 = vmatpush1.bf16.msra.mxu1 %v3776_v58  ;;  %v3860_v58 = vld [vmem:[#allocation5 + $0x290] ss:$8 sps:$4 sm:$0xff]  }
  0xca   :  { %2758 = vmatpush1.bf16.msra.mxu0 %v3779_v59  ;;  %2513 = vmatprep.subr.bf16.mxu1 %v3784_v60  ;;  %v3863_v59 = vld [vmem:[#allocation5 + $0x890] ss:$8 sps:$4 sm:$0xff]   ;;  %v3868_v60 = vld [vmem:[#allocation5 + $0x2a4] ss:$8 sps:$4 sm:$0xff]  }
  0xcb   :  { %2759 = vmatprep.subr.bf16.mxu0 %v3787_v61  ;;  %v3871_v61 = vld [vmem:[#allocation5 + $0x8a4] ss:$8 sps:$4 sm:$0xff]  }
  0xcd   :  { %2514 = vmatpush1.bf16.msra.mxu1 %v3782_v62  ;;  %v3866_v62 = vld [vmem:[#allocation5 + $0x2a0] ss:$8 sps:$4 sm:$0xff]  }
  0xce   :  { %2760 = vmatpush1.bf16.msra.mxu0 %v3785_v63  ;;  %2515 = vmatprep.subr.bf16.mxu1 %v3790_v0  ;;  %v3869_v63 = vld [vmem:[#allocation5 + $0x8a0] ss:$8 sps:$4 sm:$0xff]   ;;  %v3874_v0 = vld [vmem:[#allocation5 + $0x2b4] ss:$8 sps:$4 sm:$0xff]  }
  0xcf   :  { %2761 = vmatprep.subr.bf16.mxu0 %v3793_v1  ;;  %v3877_v1 = vld [vmem:[#allocation5 + $0x8b4] ss:$8 sps:$4 sm:$0xff]  }
  0xd1   :  { %2516 = vmatpush1.bf16.msra.mxu1 %v3788_v2  ;;  %v3872_v2 = vld [vmem:[#allocation5 + $0x2b0] ss:$8 sps:$4 sm:$0xff]  }
  0xd2   :  { %2762 = vmatpush1.bf16.msra.mxu0 %v3791_v3  ;;  %2517 = vmatprep.subr.bf16.mxu1 %v3796_v4  ;;  %v3875_v3 = vld [vmem:[#allocation5 + $0x8b0] ss:$8 sps:$4 sm:$0xff]   ;;  %v3880_v4 = vld [vmem:[#allocation5 + $0x2c4] ss:$8 sps:$4 sm:$0xff]  }
  0xd3   :  { %2763 = vmatprep.subr.bf16.mxu0 %v3799_v5  ;;  %v3883_v5 = vld [vmem:[#allocation5 + $0x8c4] ss:$8 sps:$4 sm:$0xff]  }
  0xd5   :  { %2518 = vmatpush1.bf16.msra.mxu1 %v3794_v6  ;;  %v3878_v6 = vld [vmem:[#allocation5 + $0x2c0] ss:$8 sps:$4 sm:$0xff]  }
  0xd6   :  { %2764 = vmatpush1.bf16.msra.mxu0 %v3797_v7  ;;  %2519 = vmatprep.subr.bf16.mxu1 %v3802_v8  ;;  %v3881_v7 = vld [vmem:[#allocation5 + $0x8c0] ss:$8 sps:$4 sm:$0xff]   ;;  %v3886_v8 = vld [vmem:[#allocation5 + $0x2d4] ss:$8 sps:$4 sm:$0xff]  }
  0xd7   :  { %2765 = vmatprep.subr.bf16.mxu0 %v3805_v9  ;;  %v3889_v9 = vld [vmem:[#allocation5 + $0x8d4] ss:$8 sps:$4 sm:$0xff]  }
  0xd9   :  { %2520 = vmatpush1.bf16.msra.mxu1 %v3800_v10  ;;  %v3884_v10 = vld [vmem:[#allocation5 + $0x2d0] ss:$8 sps:$4 sm:$0xff]  }
  0xda   :  { %2766 = vmatpush1.bf16.msra.mxu0 %v3803_v11  ;;  %2530 = vmatprep.subr.bf16.mxu1 %v3808_v12  ;;  %v3887_v11 = vld [vmem:[#allocation5 + $0x8d0] ss:$8 sps:$4 sm:$0xff]   ;;  %v3892_v12 = vld [vmem:[#allocation5 + $0x2e4] ss:$8 sps:$4 sm:$0xff]  }
  0xdb   :  { %2776 = vmatprep.subr.bf16.mxu0 %v3811_v15  ;;  %v3893_v15 = vld [vmem:[#allocation5 + $0x8e0] ss:$8 sps:$4 sm:$0xff]  }
  0xdc   :  { %2522 = vmatmul.mubr.bf16.vlgmr.msra.gmra.mrb[0].mxu1 %v110_v18  ;;  %v3896_v18 = vld [vmem:[#allocation5 + $0x2f0] ss:$8 sps:$4 sm:$0xff]  }
  0xdd   :  { %2768 = vmatmul.mubr.bf16.vlgmr.msra.gmra.mrb[0].mxu0 %v122_v19  ;;  %2531 = vmatpush1.bf16.msra.mxu1 %v3806_v16  ;;  %v3898_v16 = vld [vmem:[#allocation5 + $0x2f4] ss:$8 sps:$4 sm:$0xff]   ;;  %v3899_v19 = vld [vmem:[#allocation5 + $0x8f0] ss:$8 sps:$4 sm:$0xff]  }
  0xde   :  { %2777 = vmatpush1.bf16.msra.mxu0 %v3809_v17  ;;  %2532 = vmatprep.subr.bf16.mxu1 %v3814_v20  ;;  %v3901_v17 = vld [vmem:[#allocation5 + $0x8f4] ss:$8 sps:$4 sm:$0xff]   ;;  %v3904_v20 = vld [vmem:[#allocation5 + $0x304] ss:$8 sps:$4 sm:$0xff]  }
  0xdf   :  { %2778 = vmatprep.subr.bf16.mxu0 %v3817_v21  ;;  %2562 = vmatprep.mubr.bf16.mxu1 %v113_v24  ;;  %v88_v21 = vld [vmem:[#allocation2 + $0x20] sm:$0xff] }
  0xe0   :  { %2808 = vmatprep.mubr.bf16.mxu0 %v125_v29  ;;  %v3902_v24 = vld [vmem:[#allocation5 + $0x300] ss:$8 sps:$4 sm:$0xff]   ;;  %v112_v26 = vpack.c.bf16 %v88_v21, %v88_v21  ;;  %v103_v29 = vld [vmem:[#allocation2 + $0x98] sm:$0xff]  ;;  %v3991_v21 = vld [vmem:[#allocation5 + $0x9e4] ss:$8 sps:$4 sm:$0xff]  }
  0xe1   :  { %2533 = vmatpush1.bf16.msra.mxu1 %v3812_v23  ;;  %v3907_v23 = vld [vmem:[#allocation5 + $0x904] ss:$8 sps:$4 sm:$0xff]  }
  0xe2   :  { %2779 = vmatpush1.bf16.msra.mxu0 %v3815_v25  ;;  %2534 = vmatprep.subr.bf16.mxu1 %v3820_v27  ;;  %v3905_v25 = vld [vmem:[#allocation5 + $0x900] ss:$8 sps:$4 sm:$0xff]   ;;  %v124_v27 = vpack.c.bf16 %v100_v22, %v100_v22 }
  0xe3   :  { %2780 = vmatprep.subr.bf16.mxu0 %v3823_v28  ;;  %v91_v28 = vld [vmem:[#allocation2 + $0x38] sm:$0xff]  ;;  %v3986_v22 = vld [vmem:[#allocation5 + $0x3e0] ss:$8 sps:$4 sm:$0xff]  }
  0xe5   :  { %2535 = vmatpush1.bf16.msra.mxu1 %v3818_v30  ;;  %v3910_v30 = vld [vmem:[#allocation5 + $0x314] ss:$8 sps:$4 sm:$0xff]  }
  0xe6   :  { %2781 = vmatpush1.bf16.msra.mxu0 %v3821_v31  ;;  %2536 = vmatprep.subr.bf16.mxu1 %v3826_v32  ;;  %v3913_v31 = vld [vmem:[#allocation5 + $0x914] ss:$8 sps:$4 sm:$0xff]   ;;  %v115_v32 = vpack.c.bf16 %v91_v28, %v91_v28  ;;  %v4000_v28 = vld [vmem:[#allocation5 + $0x404] ss:$8 sps:$4 sm:$0xff]  }
  0xe7   :  { %2782 = vmatprep.subr.bf16.mxu0 %v3829_v33  ;;  %v127_v33 = vpack.c.bf16 %v103_v29, %v103_v29  ;;  %v90_v29 = vld [vmem:[#allocation2 + $0x30] sm:$0xff] }
  0xe9   :  { %2537 = vmatpush1.bf16.msra.mxu1 %v3824_v34  ;;  %v3908_v34 = vld [vmem:[#allocation5 + $0x310] ss:$8 sps:$4 sm:$0xff]  }
  0xea   :  { %2783 = vmatpush1.bf16.msra.mxu0 %v3827_v35  ;;  %2538 = vmatprep.subr.bf16.mxu1 %v3832_v36  ;;  %v3911_v35 = vld [vmem:[#allocation5 + $0x910] ss:$8 sps:$4 sm:$0xff]   ;;  %v3916_v36 = vld [vmem:[#allocation5 + $0x324] ss:$8 sps:$4 sm:$0xff]  }
  0xeb   :  { %2784 = vmatprep.subr.bf16.mxu0 %v3835_v37  ;;  %v3919_v37 = vld [vmem:[#allocation5 + $0x924] ss:$8 sps:$4 sm:$0xff]  }
  0xed   :  { %2539 = vmatpush1.bf16.msra.mxu1 %v3830_v38  ;;  %v3914_v38 = vld [vmem:[#allocation5 + $0x320] ss:$8 sps:$4 sm:$0xff]  }
  0xee   :  { %2785 = vmatpush1.bf16.msra.mxu0 %v3833_v39  ;;  %2540 = vmatprep.subr.bf16.mxu1 %v3838_v40  ;;  %v3917_v39 = vld [vmem:[#allocation5 + $0x920] ss:$8 sps:$4 sm:$0xff]   ;;  %v3922_v40 = vld [vmem:[#allocation5 + $0x334] ss:$8 sps:$4 sm:$0xff]  }
  0xef   :  { %2786 = vmatprep.subr.bf16.mxu0 %v3841_v41  ;;  %v3925_v41 = vld [vmem:[#allocation5 + $0x934] ss:$8 sps:$4 sm:$0xff]  }
  0xf1   :  { %2541 = vmatpush1.bf16.msra.mxu1 %v3836_v42  ;;  %v3920_v42 = vld [vmem:[#allocation5 + $0x330] ss:$8 sps:$4 sm:$0xff]  }
  0xf2   :  { %2787 = vmatpush1.bf16.msra.mxu0 %v3839_v43  ;;  %2542 = vmatprep.subr.bf16.mxu1 %v3844_v44  ;;  %v3923_v43 = vld [vmem:[#allocation5 + $0x930] ss:$8 sps:$4 sm:$0xff]   ;;  %v3928_v44 = vld [vmem:[#allocation5 + $0x344] ss:$8 sps:$4 sm:$0xff]  }
  0xf3   :  { %2788 = vmatprep.subr.bf16.mxu0 %v3847_v45  ;;  %v3931_v45 = vld [vmem:[#allocation5 + $0x944] ss:$8 sps:$4 sm:$0xff]  }
  0xf5   :  { %2543 = vmatpush1.bf16.msra.mxu1 %v3842_v46  ;;  %v3926_v46 = vld [vmem:[#allocation5 + $0x340] ss:$8 sps:$4 sm:$0xff]  }
  0xf6   :  { %2789 = vmatpush1.bf16.msra.mxu0 %v3845_v47  ;;  %2544 = vmatprep.subr.bf16.mxu1 %v3850_v48  ;;  %v3929_v47 = vld [vmem:[#allocation5 + $0x940] ss:$8 sps:$4 sm:$0xff]   ;;  %v3934_v48 = vld [vmem:[#allocation5 + $0x354] ss:$8 sps:$4 sm:$0xff]  }
  0xf7   :  { %2790 = vmatprep.subr.bf16.mxu0 %v3853_v49  ;;  %v3937_v49 = vld [vmem:[#allocation5 + $0x954] ss:$8 sps:$4 sm:$0xff]  }
  0xf9   :  { %2545 = vmatpush1.bf16.msra.mxu1 %v3848_v50  ;;  %v3932_v50 = vld [vmem:[#allocation5 + $0x350] ss:$8 sps:$4 sm:$0xff]  }
  0xfa   :  { %2791 = vmatpush1.bf16.msra.mxu0 %v3851_v51  ;;  %2546 = vmatprep.subr.bf16.mxu1 %v3856_v52  ;;  %v3935_v51 = vld [vmem:[#allocation5 + $0x950] ss:$8 sps:$4 sm:$0xff]   ;;  %v3940_v52 = vld [vmem:[#allocation5 + $0x364] ss:$8 sps:$4 sm:$0xff]  }
  0xfb   :  { %2792 = vmatprep.subr.bf16.mxu0 %v3859_v53  ;;  %v3943_v53 = vld [vmem:[#allocation5 + $0x964] ss:$8 sps:$4 sm:$0xff]  }
  0xfd   :  { %2547 = vmatpush1.bf16.msra.mxu1 %v3854_v54  ;;  %v3938_v54 = vld [vmem:[#allocation5 + $0x360] ss:$8 sps:$4 sm:$0xff]  }
  0xfe   :  { %2793 = vmatpush1.bf16.msra.mxu0 %v3857_v55  ;;  %2548 = vmatprep.subr.bf16.mxu1 %v3862_v56  ;;  %v3941_v55 = vld [vmem:[#allocation5 + $0x960] ss:$8 sps:$4 sm:$0xff]   ;;  %v3946_v56 = vld [vmem:[#allocation5 + $0x374] ss:$8 sps:$4 sm:$0xff]  }
  0xff   :  { %2794 = vmatprep.subr.bf16.mxu0 %v3865_v57  ;;  %v3949_v57 = vld [vmem:[#allocation5 + $0x974] ss:$8 sps:$4 sm:$0xff]  }
 0x101   :  { %2549 = vmatpush1.bf16.msra.mxu1 %v3860_v58  ;;  %v3944_v58 = vld [vmem:[#allocation5 + $0x370] ss:$8 sps:$4 sm:$0xff]  }
 0x102   :  { %2795 = vmatpush1.bf16.msra.mxu0 %v3863_v59  ;;  %2550 = vmatprep.subr.bf16.mxu1 %v3868_v60  ;;  %v3947_v59 = vld [vmem:[#allocation5 + $0x970] ss:$8 sps:$4 sm:$0xff]   ;;  %v3952_v60 = vld [vmem:[#allocation5 + $0x384] ss:$8 sps:$4 sm:$0xff]  }
 0x103   :  { %2796 = vmatprep.subr.bf16.mxu0 %v3871_v61  ;;  %v3955_v61 = vld [vmem:[#allocation5 + $0x984] ss:$8 sps:$4 sm:$0xff]  }
 0x105   :  { %2551 = vmatpush1.bf16.msra.mxu1 %v3866_v62  ;;  %v3950_v62 = vld [vmem:[#allocation5 + $0x380] ss:$8 sps:$4 sm:$0xff]  }
 0x106   :  { %2797 = vmatpush1.bf16.msra.mxu0 %v3869_v63  ;;  %2552 = vmatprep.subr.bf16.mxu1 %v3874_v0  ;;  %v3953_v63 = vld [vmem:[#allocation5 + $0x980] ss:$8 sps:$4 sm:$0xff]   ;;  %v3958_v0 = vld [vmem:[#allocation5 + $0x394] ss:$8 sps:$4 sm:$0xff]  }
 0x107   :  { %2798 = vmatprep.subr.bf16.mxu0 %v3877_v1  ;;  %v3961_v1 = vld [vmem:[#allocation5 + $0x994] ss:$8 sps:$4 sm:$0xff]  }
 0x109   :  { %2553 = vmatpush1.bf16.msra.mxu1 %v3872_v2  ;;  %v3956_v2 = vld [vmem:[#allocation5 + $0x390] ss:$8 sps:$4 sm:$0xff]  }
 0x10a   :  { %2799 = vmatpush1.bf16.msra.mxu0 %v3875_v3  ;;  %2554 = vmatprep.subr.bf16.mxu1 %v3880_v4  ;;  %v3959_v3 = vld [vmem:[#allocation5 + $0x990] ss:$8 sps:$4 sm:$0xff]   ;;  %v3964_v4 = vld [vmem:[#allocation5 + $0x3a4] ss:$8 sps:$4 sm:$0xff]  }
 0x10b   :  { %2800 = vmatprep.subr.bf16.mxu0 %v3883_v5  ;;  %v3967_v5 = vld [vmem:[#allocation5 + $0x9a4] ss:$8 sps:$4 sm:$0xff]  }
 0x10d   :  { %2555 = vmatpush1.bf16.msra.mxu1 %v3878_v6  ;;  %v3962_v6 = vld [vmem:[#allocation5 + $0x3a0] ss:$8 sps:$4 sm:$0xff]  }
 0x10e   :  { %2801 = vmatpush1.bf16.msra.mxu0 %v3881_v7  ;;  %2556 = vmatprep.subr.bf16.mxu1 %v3886_v8  ;;  %v3965_v7 = vld [vmem:[#allocation5 + $0x9a0] ss:$8 sps:$4 sm:$0xff]   ;;  %v3970_v8 = vld [vmem:[#allocation5 + $0x3b4] ss:$8 sps:$4 sm:$0xff]  }
 0x10f   :  { %2802 = vmatprep.subr.bf16.mxu0 %v3889_v9  ;;  %v3973_v9 = vld [vmem:[#allocation5 + $0x9b4] ss:$8 sps:$4 sm:$0xff]  }
 0x111   :  { %2557 = vmatpush1.bf16.msra.mxu1 %v3884_v10  ;;  %v3968_v10 = vld [vmem:[#allocation5 + $0x3b0] ss:$8 sps:$4 sm:$0xff]  }
 0x112   :  { %2803 = vmatpush1.bf16.msra.mxu0 %v3887_v11  ;;  %2558 = vmatprep.subr.bf16.mxu1 %v3892_v12  ;;  %v3971_v11 = vld [vmem:[#allocation5 + $0x9b0] ss:$8 sps:$4 sm:$0xff]   ;;  %v3976_v12 = vld [vmem:[#allocation5 + $0x3c4] ss:$8 sps:$4 sm:$0xff]  }
 0x113   :  { %2804 = vmatprep.subr.bf16.mxu0 %v3895_v13  ;;  %v3979_v13 = vld [vmem:[#allocation5 + $0x9c4] ss:$8 sps:$4 sm:$0xff]  }
 0x115   :  { %2559 = vmatpush1.bf16.msra.mxu1 %v3890_v14  ;;  %v3974_v14 = vld [vmem:[#allocation5 + $0x3c0] ss:$8 sps:$4 sm:$0xff]  }
 0x116   :  { %2805 = vmatpush1.bf16.msra.mxu0 %v3893_v15  ;;  %2560 = vmatprep.subr.bf16.mxu1 %v3898_v16  ;;  %v3977_v15 = vld [vmem:[#allocation5 + $0x9c0] ss:$8 sps:$4 sm:$0xff]   ;;  %v3982_v16 = vld [vmem:[#allocation5 + $0x3d4] ss:$8 sps:$4 sm:$0xff]  }
 0x117   :  { %2806 = vmatprep.subr.bf16.mxu0 %v3901_v17  ;;  %v3985_v17 = vld [vmem:[#allocation5 + $0x9d4] ss:$8 sps:$4 sm:$0xff]  }
 0x119   :  { %2561 = vmatpush1.bf16.msra.mxu1 %v3896_v18  ;;  %v3980_v18 = vld [vmem:[#allocation5 + $0x3d0] ss:$8 sps:$4 sm:$0xff]  }
 0x11a   :  { %2807 = vmatpush1.bf16.msra.mxu0 %v3899_v19  ;;  %2571 = vmatprep.subr.bf16.mxu1 %v3904_v20  ;;  %v3983_v19 = vld [vmem:[#allocation5 + $0x9d0] ss:$8 sps:$4 sm:$0xff]   ;;  %v3988_v20 = vld [vmem:[#allocation5 + $0x3e4] ss:$8 sps:$4 sm:$0xff]  }
 0x11b   :  { %2817 = vmatprep.subr.bf16.mxu0 %v3907_v23  ;;  %v3989_v23 = vld [vmem:[#allocation5 + $0x9e0] ss:$8 sps:$4 sm:$0xff]  }
 0x11c   :  { %2563 = vmatmul.mubr.bf16.vlgmr.msra.gmra.mrb[0].mxu1 %v112_v26  ;;  %v3992_v26 = vld [vmem:[#allocation5 + $0x3f0] ss:$8 sps:$4 sm:$0xff]  }
 0x11d   :  { %2809 = vmatmul.mubr.bf16.vlgmr.msra.gmra.mrb[0].mxu0 %v124_v27  ;;  %2572 = vmatpush1.bf16.msra.mxu1 %v3902_v24  ;;  %v3994_v24 = vld [vmem:[#allocation5 + $0x3f4] ss:$8 sps:$4 sm:$0xff]   ;;  %v3995_v27 = vld [vmem:[#allocation5 + $0x9f0] ss:$8 sps:$4 sm:$0xff]  }
 0x11e   :  { %2818 = vmatpush1.bf16.msra.mxu0 %v3905_v25  ;;  %2573 = vmatprep.subr.bf16.mxu1 %v3910_v30  ;;  %v3997_v25 = vld [vmem:[#allocation5 + $0x9f4] ss:$8 sps:$4 sm:$0xff]  }
 0x11f   :  { %2819 = vmatprep.subr.bf16.mxu0 %v3913_v31  ;;  %2603 = vmatprep.mubr.bf16.mxu1 %v115_v32  ;;  %v102_v30 = vld [vmem:[#allocation2 + $0x90] sm:$0xff]  ;;  %v4003_v31 = vld [vmem:[#allocation5 + $0xa04] ss:$8 sps:$4 sm:$0xff]   ;;  %v3998_v32 = vld [vmem:[#allocation5 + $0x400] ss:$8 sps:$4 sm:$0xff]  }
 0x120   :  { %2849 = vmatprep.mubr.bf16.mxu0 %v127_v33  ;;  %v4001_v33 = vld [vmem:[#allocation5 + $0xa00] ss:$8 sps:$4 sm:$0xff]  }
 0x121   :  { %2574 = vmatpush1.bf16.msra.mxu1 %v3908_v34  ;;  %v114_v34 = vpack.c.bf16 %v90_v29, %v90_v29  ;;  %v4087_v29 = vld [vmem:[#allocation5 + $0xae4] ss:$8 sps:$4 sm:$0xff]  }
 0x122   :  { %2820 = vmatpush1.bf16.msra.mxu0 %v3911_v35  ;;  %2575 = vmatprep.subr.bf16.mxu1 %v3916_v36  ;;  %v126_v35 = vpack.c.bf16 %v102_v30, %v102_v30  ;;  %v93_v36 = vld [vmem:[#allocation2 + $0x48] sm:$0xff] }
 0x123   :  { %2821 = vmatprep.subr.bf16.mxu0 %v3919_v37  ;;  %v105_v37 = vld [vmem:[#allocation2 + $0xa8] sm:$0xff] }
 0x124   :  { %v4082_v30 = vld [vmem:[#allocation5 + $0x4e0] ss:$8 sps:$4 sm:$0xff]  }
 0x125   :  { %2576 = vmatpush1.bf16.msra.mxu1 %v3914_v38  ;;  %v4006_v38 = vld [vmem:[#allocation5 + $0x414] ss:$8 sps:$4 sm:$0xff]  }
 0x126   :  { %2822 = vmatpush1.bf16.msra.mxu0 %v3917_v39  ;;  %2577 = vmatprep.subr.bf16.mxu1 %v3922_v40  ;;  %v4009_v39 = vld [vmem:[#allocation5 + $0xa14] ss:$8 sps:$4 sm:$0xff]   ;;  %v117_v40 = vpack.c.bf16 %v93_v36, %v93_v36  ;;  %v92_v36 = vld [vmem:[#allocation2 + $0x40] sm:$0xff] }
 0x127   :  { %2823 = vmatprep.subr.bf16.mxu0 %v3925_v41  ;;  %v129_v41 = vpack.c.bf16 %v105_v37, %v105_v37  ;;  %v104_v37 = vld [vmem:[#allocation2 + $0xa0] sm:$0xff] }
 0x129   :  { %2578 = vmatpush1.bf16.msra.mxu1 %v3920_v42  ;;  %v4004_v42 = vld [vmem:[#allocation5 + $0x410] ss:$8 sps:$4 sm:$0xff]  }
 0x12a   :  { %2824 = vmatpush1.bf16.msra.mxu0 %v3923_v43  ;;  %2579 = vmatprep.subr.bf16.mxu1 %v3928_v44  ;;  %v4007_v43 = vld [vmem:[#allocation5 + $0xa10] ss:$8 sps:$4 sm:$0xff]   ;;  %v4012_v44 = vld [vmem:[#allocation5 + $0x424] ss:$8 sps:$4 sm:$0xff]  }
 0x12b   :  { %2825 = vmatprep.subr.bf16.mxu0 %v3931_v45  ;;  %v4015_v45 = vld [vmem:[#allocation5 + $0xa24] ss:$8 sps:$4 sm:$0xff]  }
 0x12d   :  { %2580 = vmatpush1.bf16.msra.mxu1 %v3926_v46  ;;  %v4010_v46 = vld [vmem:[#allocation5 + $0x420] ss:$8 sps:$4 sm:$0xff]  }
 0x12e   :  { %2826 = vmatpush1.bf16.msra.mxu0 %v3929_v47  ;;  %2581 = vmatprep.subr.bf16.mxu1 %v3934_v48  ;;  %v4013_v47 = vld [vmem:[#allocation5 + $0xa20] ss:$8 sps:$4 sm:$0xff]   ;;  %v4018_v48 = vld [vmem:[#allocation5 + $0x434] ss:$8 sps:$4 sm:$0xff]  }
 0x12f   :  { %2827 = vmatprep.subr.bf16.mxu0 %v3937_v49  ;;  %v4021_v49 = vld [vmem:[#allocation5 + $0xa34] ss:$8 sps:$4 sm:$0xff]  }
 0x131   :  { %2582 = vmatpush1.bf16.msra.mxu1 %v3932_v50  ;;  %v4016_v50 = vld [vmem:[#allocation5 + $0x430] ss:$8 sps:$4 sm:$0xff]  }
 0x132   :  { %2828 = vmatpush1.bf16.msra.mxu0 %v3935_v51  ;;  %2583 = vmatprep.subr.bf16.mxu1 %v3940_v52  ;;  %v4019_v51 = vld [vmem:[#allocation5 + $0xa30] ss:$8 sps:$4 sm:$0xff]   ;;  %v4024_v52 = vld [vmem:[#allocation5 + $0x444] ss:$8 sps:$4 sm:$0xff]  }
 0x133   :  { %2829 = vmatprep.subr.bf16.mxu0 %v3943_v53  ;;  %v4027_v53 = vld [vmem:[#allocation5 + $0xa44] ss:$8 sps:$4 sm:$0xff]  }
 0x135   :  { %2584 = vmatpush1.bf16.msra.mxu1 %v3938_v54  ;;  %v4022_v54 = vld [vmem:[#allocation5 + $0x440] ss:$8 sps:$4 sm:$0xff]  }
 0x136   :  { %2830 = vmatpush1.bf16.msra.mxu0 %v3941_v55  ;;  %2585 = vmatprep.subr.bf16.mxu1 %v3946_v56  ;;  %v4025_v55 = vld [vmem:[#allocation5 + $0xa40] ss:$8 sps:$4 sm:$0xff]   ;;  %v4030_v56 = vld [vmem:[#allocation5 + $0x454] ss:$8 sps:$4 sm:$0xff]  }
 0x137   :  { %2831 = vmatprep.subr.bf16.mxu0 %v3949_v57  ;;  %v4033_v57 = vld [vmem:[#allocation5 + $0xa54] ss:$8 sps:$4 sm:$0xff]  }
 0x139   :  { %2586 = vmatpush1.bf16.msra.mxu1 %v3944_v58  ;;  %v4028_v58 = vld [vmem:[#allocation5 + $0x450] ss:$8 sps:$4 sm:$0xff]  }
 0x13a   :  { %2832 = vmatpush1.bf16.msra.mxu0 %v3947_v59  ;;  %2587 = vmatprep.subr.bf16.mxu1 %v3952_v60  ;;  %v4031_v59 = vld [vmem:[#allocation5 + $0xa50] ss:$8 sps:$4 sm:$0xff]   ;;  %v4036_v60 = vld [vmem:[#allocation5 + $0x464] ss:$8 sps:$4 sm:$0xff]  }
 0x13b   :  { %2833 = vmatprep.subr.bf16.mxu0 %v3955_v61  ;;  %v4039_v61 = vld [vmem:[#allocation5 + $0xa64] ss:$8 sps:$4 sm:$0xff]  }
 0x13d   :  { %2588 = vmatpush1.bf16.msra.mxu1 %v3950_v62  ;;  %v4034_v62 = vld [vmem:[#allocation5 + $0x460] ss:$8 sps:$4 sm:$0xff]  }
 0x13e   :  { %2834 = vmatpush1.bf16.msra.mxu0 %v3953_v63  ;;  %2589 = vmatprep.subr.bf16.mxu1 %v3958_v0  ;;  %v4037_v63 = vld [vmem:[#allocation5 + $0xa60] ss:$8 sps:$4 sm:$0xff]   ;;  %v4042_v0 = vld [vmem:[#allocation5 + $0x474] ss:$8 sps:$4 sm:$0xff]  }
 0x13f   :  { %2835 = vmatprep.subr.bf16.mxu0 %v3961_v1  ;;  %v4045_v1 = vld [vmem:[#allocation5 + $0xa74] ss:$8 sps:$4 sm:$0xff]  }
 0x141   :  { %2590 = vmatpush1.bf16.msra.mxu1 %v3956_v2  ;;  %v4040_v2 = vld [vmem:[#allocation5 + $0x470] ss:$8 sps:$4 sm:$0xff]  }
 0x142   :  { %2836 = vmatpush1.bf16.msra.mxu0 %v3959_v3  ;;  %2591 = vmatprep.subr.bf16.mxu1 %v3964_v4  ;;  %v4043_v3 = vld [vmem:[#allocation5 + $0xa70] ss:$8 sps:$4 sm:$0xff]   ;;  %v4048_v4 = vld [vmem:[#allocation5 + $0x484] ss:$8 sps:$4 sm:$0xff]  }
 0x143   :  { %2837 = vmatprep.subr.bf16.mxu0 %v3967_v5  ;;  %v4051_v5 = vld [vmem:[#allocation5 + $0xa84] ss:$8 sps:$4 sm:$0xff]  }
 0x145   :  { %2592 = vmatpush1.bf16.msra.mxu1 %v3962_v6  ;;  %v4046_v6 = vld [vmem:[#allocation5 + $0x480] ss:$8 sps:$4 sm:$0xff]  }
 0x146   :  { %2838 = vmatpush1.bf16.msra.mxu0 %v3965_v7  ;;  %2593 = vmatprep.subr.bf16.mxu1 %v3970_v8  ;;  %v4049_v7 = vld [vmem:[#allocation5 + $0xa80] ss:$8 sps:$4 sm:$0xff]   ;;  %v4054_v8 = vld [vmem:[#allocation5 + $0x494] ss:$8 sps:$4 sm:$0xff]  }
 0x147   :  { %2839 = vmatprep.subr.bf16.mxu0 %v3973_v9  ;;  %v4057_v9 = vld [vmem:[#allocation5 + $0xa94] ss:$8 sps:$4 sm:$0xff]  }
 0x149   :  { %2594 = vmatpush1.bf16.msra.mxu1 %v3968_v10  ;;  %v4052_v10 = vld [vmem:[#allocation5 + $0x490] ss:$8 sps:$4 sm:$0xff]  }
 0x14a   :  { %2840 = vmatpush1.bf16.msra.mxu0 %v3971_v11  ;;  %2595 = vmatprep.subr.bf16.mxu1 %v3976_v12  ;;  %v4055_v11 = vld [vmem:[#allocation5 + $0xa90] ss:$8 sps:$4 sm:$0xff]   ;;  %v4060_v12 = vld [vmem:[#allocation5 + $0x4a4] ss:$8 sps:$4 sm:$0xff]  }
 0x14b   :  { %2841 = vmatprep.subr.bf16.mxu0 %v3979_v13  ;;  %v4063_v13 = vld [vmem:[#allocation5 + $0xaa4] ss:$8 sps:$4 sm:$0xff]  }
 0x14d   :  { %2596 = vmatpush1.bf16.msra.mxu1 %v3974_v14  ;;  %v4058_v14 = vld [vmem:[#allocation5 + $0x4a0] ss:$8 sps:$4 sm:$0xff]  }
 0x14e   :  { %2842 = vmatpush1.bf16.msra.mxu0 %v3977_v15  ;;  %2597 = vmatprep.subr.bf16.mxu1 %v3982_v16  ;;  %v4061_v15 = vld [vmem:[#allocation5 + $0xaa0] ss:$8 sps:$4 sm:$0xff]   ;;  %v4066_v16 = vld [vmem:[#allocation5 + $0x4b4] ss:$8 sps:$4 sm:$0xff]  }
 0x14f   :  { %2843 = vmatprep.subr.bf16.mxu0 %v3985_v17  ;;  %v4069_v17 = vld [vmem:[#allocation5 + $0xab4] ss:$8 sps:$4 sm:$0xff]  }
 0x151   :  { %2598 = vmatpush1.bf16.msra.mxu1 %v3980_v18  ;;  %v4064_v18 = vld [vmem:[#allocation5 + $0x4b0] ss:$8 sps:$4 sm:$0xff]  }
 0x152   :  { %2844 = vmatpush1.bf16.msra.mxu0 %v3983_v19  ;;  %2599 = vmatprep.subr.bf16.mxu1 %v3988_v20  ;;  %v4067_v19 = vld [vmem:[#allocation5 + $0xab0] ss:$8 sps:$4 sm:$0xff]   ;;  %v4072_v20 = vld [vmem:[#allocation5 + $0x4c4] ss:$8 sps:$4 sm:$0xff]  }
 0x153   :  { %2845 = vmatprep.subr.bf16.mxu0 %v3991_v21  ;;  %v4075_v21 = vld [vmem:[#allocation5 + $0xac4] ss:$8 sps:$4 sm:$0xff]  }
 0x155   :  { %2600 = vmatpush1.bf16.msra.mxu1 %v3986_v22  ;;  %v4070_v22 = vld [vmem:[#allocation5 + $0x4c0] ss:$8 sps:$4 sm:$0xff]  }
 0x156   :  { %2846 = vmatpush1.bf16.msra.mxu0 %v3989_v23  ;;  %2601 = vmatprep.subr.bf16.mxu1 %v3994_v24  ;;  %v4073_v23 = vld [vmem:[#allocation5 + $0xac0] ss:$8 sps:$4 sm:$0xff]   ;;  %v4078_v24 = vld [vmem:[#allocation5 + $0x4d4] ss:$8 sps:$4 sm:$0xff]  }
 0x157   :  { %2847 = vmatprep.subr.bf16.mxu0 %v3997_v25  ;;  %v4081_v25 = vld [vmem:[#allocation5 + $0xad4] ss:$8 sps:$4 sm:$0xff]  }
 0x159   :  { %2602 = vmatpush1.bf16.msra.mxu1 %v3992_v26  ;;  %v4076_v26 = vld [vmem:[#allocation5 + $0x4d0] ss:$8 sps:$4 sm:$0xff]  }
 0x15a   :  { %2848 = vmatpush1.bf16.msra.mxu0 %v3995_v27  ;;  %2612 = vmatprep.subr.bf16.mxu1 %v4000_v28  ;;  %v4079_v27 = vld [vmem:[#allocation5 + $0xad0] ss:$8 sps:$4 sm:$0xff]   ;;  %v4084_v28 = vld [vmem:[#allocation5 + $0x4e4] ss:$8 sps:$4 sm:$0xff]  }
 0x15b   :  { %2858 = vmatprep.subr.bf16.mxu0 %v4003_v31  ;;  %v4085_v31 = vld [vmem:[#allocation5 + $0xae0] ss:$8 sps:$4 sm:$0xff]  }
 0x15c   :  { %2604 = vmatmul.mubr.bf16.vlgmr.msra.gmra.mrb[0].mxu1 %v114_v34  ;;  %v4088_v34 = vld [vmem:[#allocation5 + $0x4f0] ss:$8 sps:$4 sm:$0xff]  }
 0x15d   :  { %2850 = vmatmul.mubr.bf16.vlgmr.msra.gmra.mrb[0].mxu0 %v126_v35  ;;  %2613 = vmatpush1.bf16.msra.mxu1 %v3998_v32  ;;  %v4090_v32 = vld [vmem:[#allocation5 + $0x4f4] ss:$8 sps:$4 sm:$0xff]   ;;  %v4091_v35 = vld [vmem:[#allocation5 + $0xaf0] ss:$8 sps:$4 sm:$0xff]  }
 0x15e   :  { %2859 = vmatpush1.bf16.msra.mxu0 %v4001_v33  ;;  %2614 = vmatprep.subr.bf16.mxu1 %v4006_v38  ;;  %v4093_v33 = vld [vmem:[#allocation5 + $0xaf4] ss:$8 sps:$4 sm:$0xff]   ;;  %v4096_v38 = vld [vmem:[#allocation5 + $0x504] ss:$8 sps:$4 sm:$0xff]  }
 0x15f   :  { %2860 = vmatprep.subr.bf16.mxu0 %v4009_v39  ;;  %2644 = vmatprep.mubr.bf16.mxu1 %v117_v40  ;;  %v4099_v39 = vld [vmem:[#allocation5 + $0xb04] ss:$8 sps:$4 sm:$0xff]   ;;  %v116_v40 = vpack.c.bf16 %v92_v36, %v92_v36 }
 0x160   :  { %2890 = vmatprep.mubr.bf16.mxu0 %v129_v41  ;;  %v128_v41 = vpack.c.bf16 %v104_v37, %v104_v37  ;;  %v4180_v36 = vld [vmem:[#allocation5 + $0x5e4] ss:$8 sps:$4 sm:$0xff]  }
 0x161   :  { %2615 = vmatpush1.bf16.msra.mxu1 %v4004_v42  ;;  %v95_v42 = vld [vmem:[#allocation2 + $0x58] sm:$0xff]  ;;  %v4183_v37 = vld [vmem:[#allocation5 + $0xbe4] ss:$8 sps:$4 sm:$0xff]  }
 0x162   :  { %2861 = vmatpush1.bf16.msra.mxu0 %v4007_v43  ;;  %2616 = vmatprep.subr.bf16.mxu1 %v4012_v44  ;;  %v107_v43 = vld [vmem:[#allocation2 + $0xb8] sm:$0xff]  ;;  %v4094_v44 = vld [vmem:[#allocation5 + $0x500] ss:$8 sps:$4 sm:$0xff]  }
 0x163   :  { %2862 = vmatprep.subr.bf16.mxu0 %v4015_v45  ;;  %v4097_v45 = vld [vmem:[#allocation5 + $0xb00] ss:$8 sps:$4 sm:$0xff]  }
 0x165   :  { %2617 = vmatpush1.bf16.msra.mxu1 %v4010_v46  ;;  %v4102_v46 = vld [vmem:[#allocation5 + $0x514] ss:$8 sps:$4 sm:$0xff]  }
 0x166   :  { %2863 = vmatpush1.bf16.msra.mxu0 %v4013_v47  ;;  %2618 = vmatprep.subr.bf16.mxu1 %v4018_v48  ;;  %v4105_v47 = vld [vmem:[#allocation5 + $0xb14] ss:$8 sps:$4 sm:$0xff]   ;;  %v119_v48 = vpack.c.bf16 %v95_v42, %v95_v42  ;;  %v4184_v42 = vld [vmem:[#allocation5 + $0x5f0] ss:$8 sps:$4 sm:$0xff]  }
 0x167   :  { %2864 = vmatprep.subr.bf16.mxu0 %v4021_v49  ;;  %v131_v49 = vpack.c.bf16 %v107_v43, %v107_v43  ;;  %v4187_v43 = vld [vmem:[#allocation5 + $0xbf0] ss:$8 sps:$4 sm:$0xff]  }
 0x169   :  { %2619 = vmatpush1.bf16.msra.mxu1 %v4016_v50  ;;  %v4100_v50 = vld [vmem:[#allocation5 + $0x510] ss:$8 sps:$4 sm:$0xff]  }
 0x16a   :  { %2865 = vmatpush1.bf16.msra.mxu0 %v4019_v51  ;;  %2620 = vmatprep.subr.bf16.mxu1 %v4024_v52  ;;  %v4103_v51 = vld [vmem:[#allocation5 + $0xb10] ss:$8 sps:$4 sm:$0xff]   ;;  %v4108_v52 = vld [vmem:[#allocation5 + $0x524] ss:$8 sps:$4 sm:$0xff]  }
 0x16b   :  { %2866 = vmatprep.subr.bf16.mxu0 %v4027_v53  ;;  %v4111_v53 = vld [vmem:[#allocation5 + $0xb24] ss:$8 sps:$4 sm:$0xff]  }
 0x16d   :  { %2621 = vmatpush1.bf16.msra.mxu1 %v4022_v54  ;;  %v4106_v54 = vld [vmem:[#allocation5 + $0x520] ss:$8 sps:$4 sm:$0xff]  }
 0x16e   :  { %2867 = vmatpush1.bf16.msra.mxu0 %v4025_v55  ;;  %2622 = vmatprep.subr.bf16.mxu1 %v4030_v56  ;;  %v4109_v55 = vld [vmem:[#allocation5 + $0xb20] ss:$8 sps:$4 sm:$0xff]   ;;  %v4114_v56 = vld [vmem:[#allocation5 + $0x534] ss:$8 sps:$4 sm:$0xff]  }
 0x16f   :  { %2868 = vmatprep.subr.bf16.mxu0 %v4033_v57  ;;  %v4117_v57 = vld [vmem:[#allocation5 + $0xb34] ss:$8 sps:$4 sm:$0xff]  }
 0x171   :  { %2623 = vmatpush1.bf16.msra.mxu1 %v4028_v58  ;;  %v4112_v58 = vld [vmem:[#allocation5 + $0x530] ss:$8 sps:$4 sm:$0xff]  }
 0x172   :  { %2869 = vmatpush1.bf16.msra.mxu0 %v4031_v59  ;;  %2624 = vmatprep.subr.bf16.mxu1 %v4036_v60  ;;  %v4115_v59 = vld [vmem:[#allocation5 + $0xb30] ss:$8 sps:$4 sm:$0xff]   ;;  %v4120_v60 = vld [vmem:[#allocation5 + $0x544] ss:$8 sps:$4 sm:$0xff]  }
 0x173   :  { %2870 = vmatprep.subr.bf16.mxu0 %v4039_v61  ;;  %v4123_v61 = vld [vmem:[#allocation5 + $0xb44] ss:$8 sps:$4 sm:$0xff]  }
 0x175   :  { %2625 = vmatpush1.bf16.msra.mxu1 %v4034_v62  ;;  %v4118_v62 = vld [vmem:[#allocation5 + $0x540] ss:$8 sps:$4 sm:$0xff]  }
 0x176   :  { %2871 = vmatpush1.bf16.msra.mxu0 %v4037_v63  ;;  %2626 = vmatprep.subr.bf16.mxu1 %v4042_v0  ;;  %v4121_v63 = vld [vmem:[#allocation5 + $0xb40] ss:$8 sps:$4 sm:$0xff]   ;;  %v4126_v0 = vld [vmem:[#allocation5 + $0x554] ss:$8 sps:$4 sm:$0xff]  }
 0x177   :  { %2872 = vmatprep.subr.bf16.mxu0 %v4045_v1  ;;  %v4129_v1 = vld [vmem:[#allocation5 + $0xb54] ss:$8 sps:$4 sm:$0xff]  }
 0x179   :  { %2627 = vmatpush1.bf16.msra.mxu1 %v4040_v2  ;;  %v4124_v2 = vld [vmem:[#allocation5 + $0x550] ss:$8 sps:$4 sm:$0xff]  }
 0x17a   :  { %2873 = vmatpush1.bf16.msra.mxu0 %v4043_v3  ;;  %2628 = vmatprep.subr.bf16.mxu1 %v4048_v4  ;;  %v4127_v3 = vld [vmem:[#allocation5 + $0xb50] ss:$8 sps:$4 sm:$0xff]   ;;  %v4132_v4 = vld [vmem:[#allocation5 + $0x564] ss:$8 sps:$4 sm:$0xff]  }
 0x17b   :  { %2874 = vmatprep.subr.bf16.mxu0 %v4051_v5  ;;  %v4135_v5 = vld [vmem:[#allocation5 + $0xb64] ss:$8 sps:$4 sm:$0xff]  }
 0x17d   :  { %2629 = vmatpush1.bf16.msra.mxu1 %v4046_v6  ;;  %v4130_v6 = vld [vmem:[#allocation5 + $0x560] ss:$8 sps:$4 sm:$0xff]  }
 0x17e   :  { %2875 = vmatpush1.bf16.msra.mxu0 %v4049_v7  ;;  %2630 = vmatprep.subr.bf16.mxu1 %v4054_v8  ;;  %v4133_v7 = vld [vmem:[#allocation5 + $0xb60] ss:$8 sps:$4 sm:$0xff]   ;;  %v4138_v8 = vld [vmem:[#allocation5 + $0x574] ss:$8 sps:$4 sm:$0xff]  }
 0x17f   :  { %2876 = vmatprep.subr.bf16.mxu0 %v4057_v9  ;;  %v4141_v9 = vld [vmem:[#allocation5 + $0xb74] ss:$8 sps:$4 sm:$0xff]  }
 0x181   :  { %2631 = vmatpush1.bf16.msra.mxu1 %v4052_v10  ;;  %v4136_v10 = vld [vmem:[#allocation5 + $0x570] ss:$8 sps:$4 sm:$0xff]  }
 0x182   :  { %2877 = vmatpush1.bf16.msra.mxu0 %v4055_v11  ;;  %2632 = vmatprep.subr.bf16.mxu1 %v4060_v12  ;;  %v4139_v11 = vld [vmem:[#allocation5 + $0xb70] ss:$8 sps:$4 sm:$0xff]   ;;  %v4144_v12 = vld [vmem:[#allocation5 + $0x584] ss:$8 sps:$4 sm:$0xff]  }
 0x183   :  { %2878 = vmatprep.subr.bf16.mxu0 %v4063_v13  ;;  %v4147_v13 = vld [vmem:[#allocation5 + $0xb84] ss:$8 sps:$4 sm:$0xff]  }
 0x185   :  { %2633 = vmatpush1.bf16.msra.mxu1 %v4058_v14  ;;  %v4142_v14 = vld [vmem:[#allocation5 + $0x580] ss:$8 sps:$4 sm:$0xff]  }
 0x186   :  { %2879 = vmatpush1.bf16.msra.mxu0 %v4061_v15  ;;  %2634 = vmatprep.subr.bf16.mxu1 %v4066_v16  ;;  %v4145_v15 = vld [vmem:[#allocation5 + $0xb80] ss:$8 sps:$4 sm:$0xff]   ;;  %v4150_v16 = vld [vmem:[#allocation5 + $0x594] ss:$8 sps:$4 sm:$0xff]  }
 0x187   :  { %2880 = vmatprep.subr.bf16.mxu0 %v4069_v17  ;;  %v4153_v17 = vld [vmem:[#allocation5 + $0xb94] ss:$8 sps:$4 sm:$0xff]  }
 0x189   :  { %2635 = vmatpush1.bf16.msra.mxu1 %v4064_v18  ;;  %v4148_v18 = vld [vmem:[#allocation5 + $0x590] ss:$8 sps:$4 sm:$0xff]  }
 0x18a   :  { %2881 = vmatpush1.bf16.msra.mxu0 %v4067_v19  ;;  %2636 = vmatprep.subr.bf16.mxu1 %v4072_v20  ;;  %v4151_v19 = vld [vmem:[#allocation5 + $0xb90] ss:$8 sps:$4 sm:$0xff]   ;;  %v4156_v20 = vld [vmem:[#allocation5 + $0x5a4] ss:$8 sps:$4 sm:$0xff]  }
 0x18b   :  { %2882 = vmatprep.subr.bf16.mxu0 %v4075_v21  ;;  %v4159_v21 = vld [vmem:[#allocation5 + $0xba4] ss:$8 sps:$4 sm:$0xff]  }
 0x18d   :  { %2637 = vmatpush1.bf16.msra.mxu1 %v4070_v22  ;;  %v4154_v22 = vld [vmem:[#allocation5 + $0x5a0] ss:$8 sps:$4 sm:$0xff]  }
 0x18e   :  { %2883 = vmatpush1.bf16.msra.mxu0 %v4073_v23  ;;  %2638 = vmatprep.subr.bf16.mxu1 %v4078_v24  ;;  %v4157_v23 = vld [vmem:[#allocation5 + $0xba0] ss:$8 sps:$4 sm:$0xff]   ;;  %v4162_v24 = vld [vmem:[#allocation5 + $0x5b4] ss:$8 sps:$4 sm:$0xff]  }
 0x18f   :  { %2884 = vmatprep.subr.bf16.mxu0 %v4081_v25  ;;  %v4165_v25 = vld [vmem:[#allocation5 + $0xbb4] ss:$8 sps:$4 sm:$0xff]  }
 0x191   :  { %2639 = vmatpush1.bf16.msra.mxu1 %v4076_v26  ;;  %v4160_v26 = vld [vmem:[#allocation5 + $0x5b0] ss:$8 sps:$4 sm:$0xff]  }
 0x192   :  { %2885 = vmatpush1.bf16.msra.mxu0 %v4079_v27  ;;  %2640 = vmatprep.subr.bf16.mxu1 %v4084_v28  ;;  %v4163_v27 = vld [vmem:[#allocation5 + $0xbb0] ss:$8 sps:$4 sm:$0xff]   ;;  %v4168_v28 = vld [vmem:[#allocation5 + $0x5c4] ss:$8 sps:$4 sm:$0xff]  }
 0x193   :  { %2886 = vmatprep.subr.bf16.mxu0 %v4087_v29  ;;  %v4171_v29 = vld [vmem:[#allocation5 + $0xbc4] ss:$8 sps:$4 sm:$0xff]  }
 0x195   :  { %2641 = vmatpush1.bf16.msra.mxu1 %v4082_v30  ;;  %v4166_v30 = vld [vmem:[#allocation5 + $0x5c0] ss:$8 sps:$4 sm:$0xff]  }
 0x196   :  { %2887 = vmatpush1.bf16.msra.mxu0 %v4085_v31  ;;  %2642 = vmatprep.subr.bf16.mxu1 %v4090_v32  ;;  %v4169_v31 = vld [vmem:[#allocation5 + $0xbc0] ss:$8 sps:$4 sm:$0xff]   ;;  %v4174_v32 = vld [vmem:[#allocation5 + $0x5d4] ss:$8 sps:$4 sm:$0xff]  }
 0x197   :  { %2888 = vmatprep.subr.bf16.mxu0 %v4093_v33  ;;  %v4177_v33 = vld [vmem:[#allocation5 + $0xbd4] ss:$8 sps:$4 sm:$0xff]  }
 0x199   :  { %2643 = vmatpush1.bf16.msra.mxu1 %v4088_v34  ;;  %v4172_v34 = vld [vmem:[#allocation5 + $0x5d0] ss:$8 sps:$4 sm:$0xff]  }
 0x19a   :  { %2889 = vmatpush1.bf16.msra.mxu0 %v4091_v35  ;;  %2653 = vmatprep.subr.bf16.mxu1 %v4096_v38  ;;  %v4175_v35 = vld [vmem:[#allocation5 + $0xbd0] ss:$8 sps:$4 sm:$0xff]   ;;  %v4178_v38 = vld [vmem:[#allocation5 + $0x5e0] ss:$8 sps:$4 sm:$0xff]  }
 0x19b   :  { %2899 = vmatprep.subr.bf16.mxu0 %v4099_v39  ;;  %v4181_v39 = vld [vmem:[#allocation5 + $0xbe0] ss:$8 sps:$4 sm:$0xff]  }
 0x19c   :  { %2645 = vmatmul.mubr.bf16.vlgmr.msra.gmra.mrb[0].mxu1 %v116_v40  ;;  %v4186_v40 = vld [vmem:[#allocation5 + $0x5f4] ss:$8 sps:$4 sm:$0xff]  }
 0x19d   :  { %2891 = vmatmul.mubr.bf16.vlgmr.msra.gmra.mrb[0].mxu0 %v128_v41  ;;  %2654 = vmatpush1.bf16.msra.mxu1 %v4094_v44  ;;  %v4189_v41 = vld [vmem:[#allocation5 + $0xbf4] ss:$8 sps:$4 sm:$0xff]  }
 0x19e   :  { %2900 = vmatpush1.bf16.msra.mxu0 %v4097_v45  ;;  %2655 = vmatprep.subr.bf16.mxu1 %v4102_v46  ;;  %v94_v44 = vld [vmem:[#allocation2 + $0x50] sm:$0xff]  ;;  %v4190_v46 = vld [vmem:[#allocation8 + $0x40] sm:$0xff]  }
 0x19f   :  { %2901 = vmatprep.subr.bf16.mxu0 %v4105_v47  ;;  %2685 = vmatprep.mubr.bf16.mxu1 %v119_v48  ;;  %v106_v45 = vld [vmem:[#allocation2 + $0xb0] sm:$0xff]  ;;  %v118_v47 = vpack.c.bf16 %v94_v44, %v94_v44 }
 0x1a0   :  { %2931 = vmatprep.mubr.bf16.mxu0 %v131_v49  ;;  %v130_v48 = vpack.c.bf16 %v106_v45, %v106_v45  ;;  %v4191_v49 = vld [vmem:[#allocation8] sm:$0xff]  }
 0x1a1   :  { %2656 = vmatpush1.bf16.msra.mxu1 %v4100_v50  ;;  %v4192_v50 = vld [vmem:[#allocation8 + $0x48] sm:$0xff]  }
 0x1a2   :  { %2902 = vmatpush1.bf16.msra.mxu0 %v4103_v51  ;;  %2657 = vmatprep.subr.bf16.mxu1 %v4108_v52  ;;  %v4193_v51 = vld [vmem:[#allocation8 + $0x8] sm:$0xff]   ;;  %v4194_v52 = vld [vmem:[#allocation8 + $0x50] sm:$0xff]  }
 0x1a3   :  { %2903 = vmatprep.subr.bf16.mxu0 %v4111_v53  ;;  %v4195_v53 = vld [vmem:[#allocation8 + $0x10] sm:$0xff]  }
 0x1a5   :  { %2658 = vmatpush1.bf16.msra.mxu1 %v4106_v54  ;;  %v4196_v54 = vld [vmem:[#allocation8 + $0x58] sm:$0xff]  }
 0x1a6   :  { %2904 = vmatpush1.bf16.msra.mxu0 %v4109_v55  ;;  %2659 = vmatprep.subr.bf16.mxu1 %v4114_v56  ;;  %v4197_v55 = vld [vmem:[#allocation8 + $0x18] sm:$0xff]   ;;  %v4198_v56 = vld [vmem:[#allocation8 + $0x60] sm:$0xff]  }
 0x1a7   :  { %2905 = vmatprep.subr.bf16.mxu0 %v4117_v57  ;;  %v4199_v57 = vld [vmem:[#allocation8 + $0x20] sm:$0xff]  }
 0x1a9   :  { %2660 = vmatpush1.bf16.msra.mxu1 %v4112_v58  ;;  %v4200_v58 = vld [vmem:[#allocation8 + $0x68] sm:$0xff]  }
 0x1aa   :  { %2906 = vmatpush1.bf16.msra.mxu0 %v4115_v59  ;;  %2661 = vmatprep.subr.bf16.mxu1 %v4120_v60  ;;  %v4201_v59 = vld [vmem:[#allocation8 + $0x28] sm:$0xff]   ;;  %v4202_v60 = vld [vmem:[#allocation8 + $0x70] sm:$0xff]  }
 0x1ab   :  { %2907 = vmatprep.subr.bf16.mxu0 %v4123_v61  ;;  %v4203_v61 = vld [vmem:[#allocation8 + $0x30] sm:$0xff]  }
 0x1ad   :  { %2662 = vmatpush1.bf16.msra.mxu1 %v4118_v62  ;;  %v4204_v62 = vld [vmem:[#allocation8 + $0x78] sm:$0xff]  }
 0x1ae   :  { %2908 = vmatpush1.bf16.msra.mxu0 %v4121_v63  ;;  %2663 = vmatprep.subr.bf16.mxu1 %v4126_v0  ;;  %v4205_v63 = vld [vmem:[#allocation8 + $0x38] sm:$0xff]   ;;  %v518_v0 = vlaneseq }
 0x1af   :  { %2909 = vmatprep.subr.bf16.mxu0 %v4129_v1 }
 0x1b0   :  { %v519_v1 = vshrl.u32 %v518_v0, 7 }
 0x1b1   :  { %2664 = vmatpush1.bf16.msra.mxu1 %v4124_v2 }
 0x1b2   :  { %2910 = vmatpush1.bf16.msra.mxu0 %v4127_v3  ;;  %2665 = vmatprep.subr.bf16.mxu1 %v4132_v4  ;;  %v520_v2 = vsub.s32 0, %v519_v1  ;;  %v516_v3 = vld [vmem:[#allocation7] sm:$0x3]  ;;  %v524_v4 = vsub.s32 1, %v519_v1 }
 0x1b3   :  { %2911 = vmatprep.subr.bf16.mxu0 %v4135_v5 }
 0x1b4   :  { %v521_v5 = vrot.slane %v516_v3, %v520_v2 }
 0x1b5   :  { %2666 = vmatpush1.bf16.msra.mxu1 %v4130_v6  ;;  %v525_v6 = vrot.slane %v516_v3, %v524_v4 }
 0x1b6   :  { %2912 = vmatpush1.bf16.msra.mxu0 %v4133_v7  ;;  %2667 = vmatprep.subr.bf16.mxu1 %v4138_v8 }
 0x1b7   :  { %2913 = vmatprep.subr.bf16.mxu0 %v4141_v9 }
 0x1b9   :  { %2668 = vmatpush1.bf16.msra.mxu1 %v4136_v10 }
 0x1ba   :  { %2914 = vmatpush1.bf16.msra.mxu0 %v4139_v11  ;;  %2669 = vmatprep.subr.bf16.mxu1 %v4144_v12 }
 0x1bb   :  { %2915 = vmatprep.subr.bf16.mxu0 %v4147_v13 }
 0x1bd   :  { %2670 = vmatpush1.bf16.msra.mxu1 %v4142_v14 }
 0x1be   :  { %2916 = vmatpush1.bf16.msra.mxu0 %v4145_v15  ;;  %2671 = vmatprep.subr.bf16.mxu1 %v4150_v16 }
 0x1bf   :  { %2917 = vmatprep.subr.bf16.mxu0 %v4153_v17 }
 0x1c1   :  { %2672 = vmatpush1.bf16.msra.mxu1 %v4148_v18 }
 0x1c2   :  { %2918 = vmatpush1.bf16.msra.mxu0 %v4151_v19  ;;  %2673 = vmatprep.subr.bf16.mxu1 %v4156_v20 }
 0x1c3   :  { %2919 = vmatprep.subr.bf16.mxu0 %v4159_v21 }
 0x1c5   :  { %2674 = vmatpush1.bf16.msra.mxu1 %v4154_v22 }
 0x1c6   :  { %2920 = vmatpush1.bf16.msra.mxu0 %v4157_v23  ;;  %2675 = vmatprep.subr.bf16.mxu1 %v4162_v24  ;;  %v3521_v24 = vld [vmem:[#allocation10] ss:$0 sm:$0xff] }
 0x1c7   :  { %2921 = vmatprep.subr.bf16.mxu0 %v4165_v25 }
 0x1c9   :  { %2676 = vmatpush1.bf16.msra.mxu1 %v4160_v26 }
 0x1ca   :  { %2922 = vmatpush1.bf16.msra.mxu0 %v4163_v27  ;;  %2677 = vmatprep.subr.bf16.mxu1 %v4168_v28 }
 0x1cb   :  { %2923 = vmatprep.subr.bf16.mxu0 %v4171_v29 }
 0x1cd   :  { %2678 = vmatpush1.bf16.msra.mxu1 %v4166_v30 }
 0x1ce   :  { %2924 = vmatpush1.bf16.msra.mxu0 %v4169_v31  ;;  %2679 = vmatprep.subr.bf16.mxu1 %v4174_v32 }
 0x1cf   :  { %2925 = vmatprep.subr.bf16.mxu0 %v4177_v33 }
 0x1d1   :  { %2680 = vmatpush1.bf16.msra.mxu1 %v4172_v34 }
 0x1d2   :  { %2926 = vmatpush1.bf16.msra.mxu0 %v4175_v35  ;;  %2681 = vmatprep.subr.bf16.mxu1 %v4180_v36 }
 0x1d3   :  { %2927 = vmatprep.subr.bf16.mxu0 %v4183_v37 }
 0x1d5   :  { %2682 = vmatpush1.bf16.msra.mxu1 %v4178_v38 }
 0x1d6   :  { %2928 = vmatpush1.bf16.msra.mxu0 %v4181_v39  ;;  %2683 = vmatprep.subr.bf16.mxu1 %v4186_v40 }
 0x1d7   :  { %2929 = vmatprep.subr.bf16.mxu0 %v4189_v41 }
 0x1d9   :  { %2684 = vmatpush1.bf16.msra.mxu1 %v4184_v42 }
 0x1da   :  { %2930 = vmatpush1.bf16.msra.mxu0 %v4187_v43  ;;  %3538 = vmatprep.subr.bf16.mxu1 %v4190_v46 }
 0x1dc   :  { %2686 = vmatmul.mubr.bf16.vlgmr.msra.gmra.mrb[0].mxu1 %v118_v47 }
 0x1dd   :  { %2932 = vmatmul.mubr.bf16.vlgmr.msra.gmra.mrb[0].mxu0 %v130_v48  ;;  %3539 = vmatpush3.bf16.msra.mxu1 %v4191_v49 }
 0x1de   :  { %3540 = vmatprep.subr.bf16.mxu1 %v4192_v50 }
 0x1e1   :  { %3541 = vmatpush3.bf16.msra.mxu1 %v4193_v51 }
 0x1e2   :  { %3542 = vmatprep.subr.bf16.mxu1 %v4194_v52 }
 0x1e5   :  { %3543 = vmatpush3.bf16.msra.mxu1 %v4195_v53 }
 0x1e6   :  { %3544 = vmatprep.subr.bf16.mxu1 %v4196_v54 }
 0x1e9   :  { %3545 = vmatpush3.bf16.msra.mxu1 %v4197_v55 }
 0x1ea   :  { %3546 = vmatprep.subr.bf16.mxu1 %v4198_v56 }
 0x1ed   :  { %3547 = vmatpush3.bf16.msra.mxu1 %v4199_v57 }
 0x1ee   :  { %3548 = vmatprep.subr.bf16.mxu1 %v4200_v58 }
 0x1f1   :  { %3549 = vmatpush3.bf16.msra.mxu1 %v4201_v59 }
 0x1f2   :  { %3550 = vmatprep.subr.bf16.mxu1 %v4202_v60 }
 0x1f5   :  { %3551 = vmatpush3.bf16.msra.mxu1 %v4203_v61 }
 0x1f6   :  { %3552 = vmatprep.subr.bf16.mxu1 %v4204_v62 }
 0x1f9   :  { %3553 = vmatpush3.bf16.msra.mxu1 %v4205_v63 }
 0x2af   :  { %v2687_v7 = vpop.f32.mrb[0].mxu1 }
 0x2b0   :  { %v2933_v8 = vpop.f32.mrb[0].mxu0  ;;  %v3560_v9 = vadd.f32 %v2687_v7, %v521_v5  ;;  %v2689_v10 = vpop.f32.mrb[1].mxu1 }
 0x2b1   :  { %v2935_v11 = vpop.f32.mrb[1].mxu0  ;;  %v3562_v12 = vadd.f32 %v2689_v10, %v525_v6  ;;  %v2691_v13 = vpop.f32.mrb[2].mxu1 }
 0x2b2   :  { %v2937_v14 = vpop.f32.mrb[2].mxu0  ;;  %v3561_v15 = vadd.f32 %v3560_v9, %v2933_v8  ;;  %v2692_v16 = vpop.f32.mrb[3].mxu1 }
 0x2b3   :  { %v2938_v17 = vpop.f32.mrb[3].mxu0  ;;  %v3563_v18 = vadd.f32 %v3562_v12, %v2935_v11 }
 0x2b4   :  { %v2940_v19 = vmax.f32 %v3561_v15, 0.0 }
 0x2b5   :  { %v2941_v20 = vmax.f32 %v3563_v18, 0.0 }
 0x2b6   :  { %v2942_v22 = vpack.c.bf16 %v2940_v19, %v2940_v19 }
 0x2b7   :  { %v2943_v21 = vpack.c.bf16 %v2941_v20, %v2941_v20 }
 0x2b9   :  { %3111 = vmatprep.mubr.bf16.mxu1 %v2943_v21 }
 0x2ba   :  { %3112 = vmatmul.mubr.bf16.vlgmr.msra.gmra.mrb[4].mxu1 %v2942_v22 }
 0x38d   :  { %v3554_v23 = vpop.f32.mrb[4].mxu1 }
 0x38e   :  { %v3555_v25 = vpop.f32.mrb[5].mxu1 }
 0x38f   :  { %v3556_v26 = vadd.f32 %v3555_v25, %v3554_v23  ;;  %v3557_v27 = vpop.f32.mrb[6].mxu1 }
 0x390   :  { %v3558_v28 = vpop.f32.mrb[7].mxu1 }
 0x391   :  { %v3114_v29 = vadd.f32 %v3556_v26, %v3521_v24 }
 0x393   :  { %3119 = vst [vmem:[#allocation11] sm:$0xff] %v3114_v29 }
 0x394   :  { %4327 = shalt.err (!%p4324_p2)
}
 0x395   :  { %s4328_s6 = scalar_lea.hbm %s4463_s5, 128 }
 0x396   :  { %p4329_p3 = scmp.ne.s32.totalorder %s4463_s5, %s4328_s6  ;;  %p4332_p4 = scmp.lt.u32.totalorder %s4328_s6, %s4463_s5 }
 0x398   :  { %p4334_p5 = pnand %p4332_p4, %p4329_p3 }
 0x39a   :  { %4337 = shalt.err (!%p4334_p5)
}
 0x39b   :  { %3129 = dma.vmem_to_hbm [thread:$0]  %s3127_s28, 128, %s4463_s5, [#allocation4]  }
 0x39c   :  { %4344 = dma.done.wait [#allocation4], 128  }
 0x39d   :  { %4345 = vsyncadd [#allocation4], 4294967168 }
 0x39e   :  { %3133 = vsyncpa [#allocation3], 1 }
 0x39f   :  { %3134 = vsyncpa [#allocation6], 1 }
 0x3a0   :  { %3135 = vsyncpa [#allocation9], 1 }
 0x3a1   :  { %3136 = vsyncpa [#allocation4], 1 }

</bundles_post_ra>
